<compile_context>
chip_gen: v7x
topology: tpu7x:2x2x1
jax: 0.10.0
libtpu: 0.0.40
codegen_flags: <defaults>
</compile_context>

<pallas_src>
import functools

import jax
import jax.numpy as jnp
from jax import lax
from jax.experimental import pallas as pl
from jax.experimental.pallas import tpu as pltpu

# ---------------- model dims (fixed by the PyTorch module) ----------------
IN_H = IN_W = 28
IN_PIX = IN_H * IN_W                         # 784
KH = KW = 7
STRIDE = 3
C_OUT = 8
OUT_DIM = (IN_H - KH) // STRIDE + 1          # 8
N_PATCH = OUT_DIM * OUT_DIM                  # 64 conv output positions / image
FLAT = N_PATCH * C_OUT                       # 512 (fc1 input size)
HIDDEN = 128
OUTPUT = 2


def _round_up(x, m):
    return ((x + m - 1) // m) * m


# ---------------- fused Pallas kernel ----------------
def _fused_convnet_kernel(x_ref, wc_ref, bc_ref, w1_ref, b1_ref, w2_ref, b2_ref, o_ref):
    """conv(as dense matmul)+bias+square -> fc1+bias+square -> fc2+bias, all on-chip.

    x_ref : (TB, 784)  flattened f32 images, column = ih*28 + iw
    wc_ref: (784, 512) dense conv-as-linear weight, column = (oh*8+ow)*8 + c
    bc_ref: (1, 512)   conv bias tiled per patch position (f32)
    w1_ref: (512, 128) fc1 weight with input columns permuted to (p, c) order
    w2_ref: (128, 2)   fc2 weight (transposed)
    o_ref : (TB, 2)
    """
    # In-kernel cast to the compute dtype: avoids a separate HBM cast pass and
    # reads f32 (4 B/elem) instead of f32-read + bf16-write + bf16-read (8 B/elem).
    x = x_ref[...].astype(wc_ref.dtype)

    # Conv as one lane-dense MXU matmul -> (TB, 512), column j = (oh*8+ow)*8 + c.
    h = jnp.dot(x, wc_ref[...], preferred_element_type=jnp.float32)
    h = h + bc_ref[...]
    h = h * h                                   # conv .pow(2) in f32 (VPU)
    h = h.astype(w1_ref.dtype)                  # back to compute dtype for the MXU

    z = jnp.dot(h, w1_ref[...], preferred_element_type=jnp.float32)
    z = z + b1_ref[...]
    z = z * z                                   # fc1 .pow(2) in f32
    z = z.astype(w2_ref.dtype)

    y = jnp.dot(z, w2_ref[...], preferred_element_type=jnp.float32)
    o_ref[...] = (y + b2_ref[...]).astype(o_ref.dtype)


# ---------------- trace-time weight preparation (do once, not per step) ----------------
def prepare_params(params, compute_dtype=jnp.bfloat16):
    """Fold conv / NCHW-flatten / fc1 layouts into kernel-ready operands.

    compute_dtype=bfloat16 (default) halves weight HBM/VMEM traffic and uses
    single-pass MXU matmuls; expected error after the two squaring stages is
    ~1-2% relative.  Pass jnp.float32 for reference-grade numerics.
    """
    f32 = jnp.float32
    hp = lax.Precision.HIGHEST

    wmat = params["conv_w"].reshape(C_OUT, KH, KW).astype(f32)            # (8, 7, 7)
    # One-hot selectors: which input row/col feeds (output position, kernel tap).
    sel_h = (jnp.arange(IN_H)[None, None, :]
             == (STRIDE * jnp.arange(OUT_DIM)[:, None, None]
                 + jnp.arange(KH)[None, :, None])).astype(f32)            # (8, 7, 28)
    sel_w = (jnp.arange(IN_W)[None, None, :]
             == (STRIDE * jnp.arange(OUT_DIM)[:, None, None]
                 + jnp.arange(KW)[None, :, None])).astype(f32)            # (8, 7, 28)
    # Dense conv-as-linear: wc[ih*28+iw, (oh*8+ow)*8+c] = conv_w[c, ih-3*oh, iw-3*ow].
    # Each output element has at most one contributing term; HIGHEST precision keeps
    # this construction exact even on the MXU.
    wc = jnp.einsum("aki,blj,ckl->ijabc", sel_h, sel_w, wmat,
                    precision=hp).reshape(IN_PIX, FLAT)                   # (784, 512)
    # Conv bias per output column (column order (p, c) -> bias[c]).
    bc = jnp.tile(params["conv_b"].astype(f32), N_PATCH).reshape(1, FLAT)
    # fc1 weight: permute its 512 input columns from NCHW-flatten order (c*64 + p)
    # to the kernel's (p*8 + c) order -> the torch .view transpose disappears at runtime.
    w1p = (params["fc1_w"].astype(f32)
           .reshape(HIDDEN, C_OUT, N_PATCH)      # (h, c, p)
           .transpose(2, 1, 0)                   # (p, c, h)
           .reshape(FLAT, HIDDEN))               # row = p*8 + c
    w2p = params["fc2_w"].astype(f32).T          # (128, 2)
    return {
        "wc": wc.astype(compute_dtype),
        "bc": bc,                                                  # f32 bias row
        "w1": w1p.astype(compute_dtype),
        "b1": params["fc1_b"].astype(f32).reshape(1, HIDDEN),
        "w2": w2p.astype(compute_dtype),
        "b2": params["fc2_b"].astype(f32).reshape(1, OUTPUT),
    }


# ---------------- batch tile selection ----------------
def _pick_batch_tile(b, tile_b):
    """Large tiles amortize ~0.35us/step; >=2 grid steps keep both v7x TCs busy."""
    if b > tile_b:
        assert tile_b % 16 == 0, "tile_b must be a multiple of 16 (bf16 sublane packing)"
        return tile_b
    if b >= 64:
        # Mid-size batch: split into 2 grid steps so dimension_semantics=("parallel",)
        # can shard them across v7x's 2 TensorCores.
        return _round_up(pl.cdiv(b, 2), 16)
    return b   # tiny batch: single step; block dim == full array dim is legal


# ---------------- forward ----------------
def convnet_forward(x, prep, *, tile_b=256):
    b = x.shape[0]
    # NCHW (B,1,28,28) -> (B,784): contiguous reshape, no HBM data movement.
    x2d = x.reshape(b, IN_PIX).astype(jnp.float32)

    tb = _pick_batch_tile(b, tile_b)
    # Ragged last tile handled by Pallas partial blocks (OOB reads padded, OOB
    # writes dropped) -> no jnp.pad copy over the input stream.
    n_steps = pl.cdiv(b, tb)

    w_itemsize = jnp.dtype(prep["wc"].dtype).itemsize
    flops = 2 * b * (IN_PIX * FLAT + FLAT * HIDDEN + HIDDEN * OUTPUT)
    bytes_accessed = (b * IN_PIX * 4                                              # f32 images
                      + (IN_PIX * FLAT + FLAT * HIDDEN + HIDDEN * OUTPUT) * w_itemsize
                      + (FLAT + HIDDEN + OUTPUT) * 4                              # f32 biases
                      + b * OUTPUT * 4)                                           # f32 output

    grid_spec = pltpu.PrefetchScalarGridSpec(
        num_scalar_prefetch=0,
        grid=(n_steps,),
        in_specs=[
            pl.BlockSpec((tb, IN_PIX), lambda i: (i, 0)),       # streamed per batch tile
            pl.BlockSpec((IN_PIX, FLAT), lambda i: (0, 0)),     # VMEM-resident weights
            pl.BlockSpec((1, FLAT), lambda i: (0, 0)),
            pl.BlockSpec((FLAT, HIDDEN), lambda i: (0, 0)),
            pl.BlockSpec((1, HIDDEN), lambda i: (0, 0)),
            pl.BlockSpec((HIDDEN, OUTPUT), lambda i: (0, 0)),
            pl.BlockSpec((1, OUTPUT), lambda i: (0, 0)),
        ],
        out_specs=pl.BlockSpec((tb, OUTPUT), lambda i: (i, 0)),
    )

    # VMEM budget @ tb=256: 2 x (256x784x4) = 1.6 MiB input + double-buffered weights
    # (~1.9 MiB bf16 / ~3.7 MiB f32) + <1 MiB intermediates  ->  well under 32 MiB,
    # so no pl.Buffered(1) single-buffering of the pinned weights is needed.
    out = pl.pallas_call(
        _fused_convnet_kernel,
        out_shape=jax.ShapeDtypeStruct((b, OUTPUT), jnp.float32),
        grid_spec=grid_spec,
        compiler_params=pltpu.CompilerParams(
            dimension_semantics=("parallel",),        # shard batch tiles across v7x's 2 TCs
            vmem_limit_bytes=32 * 1024 * 1024,
        ),
        cost_estimate=pl.CostEstimate(
            flops=flops, transcendentals=0, bytes_accessed=bytes_accessed),
    )(x2d, prep["wc"], prep["bc"], prep["w1"], prep["b1"], prep["w2"], prep["b2"])
    return out


# ---------------- pure-JAX reference (PyTorch semantics, full f32) ----------------
def reference_forward(x, params):
    hp = lax.Precision.HIGHEST
    y = lax.conv_general_dilated(
        x.astype(jnp.float32), params["conv_w"], window_strides=(STRIDE, STRIDE),
        padding="VALID", dimension_numbers=("NCHW", "OIHW", "NCHW"), precision=hp)
    y = y + params["conv_b"][None, :, None, None]
    y = y * y
    y = y.reshape(x.shape[0], FLAT)                       # NCHW flatten == torch .view
    h = jnp.dot(y, params["fc1_w"].T, precision=hp) + params["fc1_b"]
    h = h * h
    return jnp.dot(h, params["fc2_w"].T, precision=hp) + params["fc2_b"]


def init_params(key):
    ks = jax.random.split(key, 6)
    s = 0.1
    return {
        "conv_w": s * jax.random.normal(ks[0], (C_OUT, 1, KH, KW), jnp.float32),
        "conv_b": s * jax.random.normal(ks[1], (C_OUT,), jnp.float32),
        "fc1_w": s * jax.random.normal(ks[2], (HIDDEN, FLAT), jnp.float32),
        "fc1_b": s * jax.random.normal(ks[3], (HIDDEN,), jnp.float32),
        "fc2_w": s * jax.random.normal(ks[4], (OUTPUT, HIDDEN), jnp.float32),
        "fc2_b": s * jax.random.normal(ks[5], (OUTPUT,), jnp.float32),
    }


if __name__ == "__main__":
    import numpy as np

    key = jax.random.PRNGKey(0)
    k_x, k_p = jax.random.split(key)
    B = 2
    x = jax.random.normal(k_x, (B, 1, IN_H, IN_W), jnp.float32)
    params = init_params(k_p)
    ref = reference_forward(x, params)

    fwd = jax.jit(functools.partial(convnet_forward, tile_b=256))

    # f32 compute path (matches the PyTorch module's numerics).
    prep32 = prepare_params(params, compute_dtype=jnp.float32)
    out32 = jax.block_until_ready(fwd(x, prep32))
    assert out32.shape == (B, OUTPUT) and out32.dtype == jnp.float32
    np.testing.assert_allclose(np.asarray(out32), np.asarray(ref), rtol=5e-2, atol=1e-1)

    # bf16 compute path (default / recommended). Expected error from bf16 rounding,
    # amplified by the two .pow(2) stages, is ~1-2% relative; a structural/layout
    # bug would show up as O(1) deviations, far above these tolerances.
    prep16 = prepare_params(params, compute_dtype=jnp.bfloat16)
    out16 = jax.block_until_ready(fwd(x, prep16))
    assert out16.shape == (B, OUTPUT) and out16.dtype == jnp.float32
    np.testing.assert_allclose(np.asarray(out16), np.asarray(ref), rtol=2e-1, atol=2.5e-1)

    # Multi-step grid with a ragged last tile (exercises partial blocks, no pad copy).
    B2 = 40
    x2 = jax.random.normal(jax.random.PRNGKey(1), (B2, 1, IN_H, IN_W), jnp.float32)
    fwd_small_tile = jax.jit(functools.partial(convnet_forward, tile_b=16))
    out2 = jax.block_until_ready(fwd_small_tile(x2, prep16))
    assert out2.shape == (B2, OUTPUT)
    np.testing.assert_allclose(np.asarray(out2),
                               np.asarray(reference_forward(x2, params)),
                               rtol=2e-1, atol=2.5e-1)

    # Mid-size batch: the tile picker splits it into 2 grid steps (v7x 2-TC path)
    # with a ragged last tile, default tile_b.
    B3 = 72
    x3 = jax.random.normal(jax.random.PRNGKey(2), (B3, 1, IN_H, IN_W), jnp.float32)
    out3 = jax.block_until_ready(fwd(x3, prep16))
    assert out3.shape == (B3, OUTPUT)
    np.testing.assert_allclose(np.asarray(out3),
                               np.asarray(reference_forward(x3, params)),
                               rtol=2e-1, atol=2.5e-1)

    print("KERNEL_OK")
</pallas_src>

<mosaic_0001>
module attributes {stable_mosaic.version = 11 : i64} {
  func.func @_fused_convnet_kernel(%arg0: i32, %arg1: memref<2x784xf32, #tpu.memory_space<vmem>>, %arg2: memref<784x512xf32, #tpu.memory_space<vmem>>, %arg3: memref<1x512xf32, #tpu.memory_space<vmem>>, %arg4: memref<512x128xf32, #tpu.memory_space<vmem>>, %arg5: memref<1x128xf32, #tpu.memory_space<vmem>>, %arg6: memref<128x2xf32, #tpu.memory_space<vmem>>, %arg7: memref<1x2xf32, #tpu.memory_space<vmem>>, %arg8: memref<2x2xf32, #tpu.memory_space<vmem>>) attributes {dimension_semantics = [#tpu.dimension_semantics<parallel>], iteration_bounds = array<i64: 1>, scalar_prefetch = 0 : i64, scratch_operands = 0 : i64, tpu.core_type = #tpu.core_type<tc>, window_params = [{transform_indices = @transform_0, window_bounds = array<i64: 2, 784>}, {pipeline_mode = #tpu.pipeline_mode<synchronous>, transform_indices = @transform_1, window_bounds = array<i64: 784, 512>}, {pipeline_mode = #tpu.pipeline_mode<synchronous>, transform_indices = @transform_2, window_bounds = array<i64: 1, 512>}, {pipeline_mode = #tpu.pipeline_mode<synchronous>, transform_indices = @transform_3, window_bounds = array<i64: 512, 128>}, {pipeline_mode = #tpu.pipeline_mode<synchronous>, transform_indices = @transform_4, window_bounds = array<i64: 1, 128>}, {pipeline_mode = #tpu.pipeline_mode<synchronous>, transform_indices = @transform_5, window_bounds = array<i64: 128, 2>}, {pipeline_mode = #tpu.pipeline_mode<synchronous>, transform_indices = @transform_6, window_bounds = array<i64: 1, 2>}, {transform_indices = @transform_7, window_bounds = array<i64: 2, 2>}]} {
    %c0 = arith.constant 0 : index
    %c0_0 = arith.constant 0 : index
    %0 = vector.load %arg1[%c0, %c0_0] : memref<2x784xf32, #tpu.memory_space<vmem>>, vector<2x784xf32>
    %c0_1 = arith.constant 0 : index
    %c0_2 = arith.constant 0 : index
    %1 = vector.load %arg2[%c0_1, %c0_2] : memref<784x512xf32, #tpu.memory_space<vmem>>, vector<784x512xf32>
    %cst = arith.constant dense<0.000000e+00> : vector<2x512xf32>
    %2 = tpu.matmul %0, %1, %cst {dimension_numbers = #tpu.dot_dimension_numbers<[1], [0], [0], [1], [0, 0, 1, 1], [], []>} : vector<2x784xf32>, vector<784x512xf32>, vector<2x512xf32> -> vector<2x512xf32>
    %c0_3 = arith.constant 0 : index
    %c0_4 = arith.constant 0 : index
    %3 = vector.load %arg3[%c0_3, %c0_4] : memref<1x512xf32, #tpu.memory_space<vmem>>, vector<1x512xf32>
    %4 = vector.broadcast %3 : vector<1x512xf32> to vector<2x512xf32>
    %5 = arith.addf %2, %4 : vector<2x512xf32>
    %6 = arith.mulf %5, %5 : vector<2x512xf32>
    %c0_5 = arith.constant 0 : index
    %c0_6 = arith.constant 0 : index
    %7 = vector.load %arg4[%c0_5, %c0_6] : memref<512x128xf32, #tpu.memory_space<vmem>>, vector<512x128xf32>
    %cst_7 = arith.constant dense<0.000000e+00> : vector<2x128xf32>
    %8 = tpu.matmul %6, %7, %cst_7 {dimension_numbers = #tpu.dot_dimension_numbers<[1], [0], [0], [1], [0, 0, 1, 1], [], []>} : vector<2x512xf32>, vector<512x128xf32>, vector<2x128xf32> -> vector<2x128xf32>
    %c0_8 = arith.constant 0 : index
    %c0_9 = arith.constant 0 : index
    %9 = vector.load %arg5[%c0_8, %c0_9] : memref<1x128xf32, #tpu.memory_space<vmem>>, vector<1x128xf32>
    %10 = vector.broadcast %9 : vector<1x128xf32> to vector<2x128xf32>
    %11 = arith.addf %8, %10 : vector<2x128xf32>
    %12 = arith.mulf %11, %11 : vector<2x128xf32>
    %c0_10 = arith.constant 0 : index
    %c0_11 = arith.constant 0 : index
    %13 = vector.load %arg6[%c0_10, %c0_11] : memref<128x2xf32, #tpu.memory_space<vmem>>, vector<128x2xf32>
    %cst_12 = arith.constant dense<0.000000e+00> : vector<2x2xf32>
    %14 = tpu.matmul %12, %13, %cst_12 {dimension_numbers = #tpu.dot_dimension_numbers<[1], [0], [0], [1], [0, 0, 1, 1], [], []>} : vector<2x128xf32>, vector<128x2xf32>, vector<2x2xf32> -> vector<2x2xf32>
    %c0_13 = arith.constant 0 : index
    %c0_14 = arith.constant 0 : index
    %15 = vector.load %arg7[%c0_13, %c0_14] : memref<1x2xf32, #tpu.memory_space<vmem>>, vector<1x2xf32>
    %16 = vector.broadcast %15 : vector<1x2xf32> to vector<2x2xf32>
    %17 = arith.addf %14, %16 : vector<2x2xf32>
    %c0_15 = arith.constant 0 : index
    %c0_16 = arith.constant 0 : index
    %18 = vector.load %arg8[%c0_15, %c0_16] : memref<2x2xf32, #tpu.memory_space<vmem>>, vector<2x2xf32>
    tpu.vector_store %arg8[%c0_15, %c0_16], %17 {strides = array<i32>} : memref<2x2xf32, #tpu.memory_space<vmem>>, vector<2x2xf32>,
    return
  }
  func.func @transform_0(%arg0: i32) -> (i32, i32) {
    %c0_i32 = arith.constant 0 : i32
    %c0_i32_0 = arith.constant 0 : i32
    return %arg0, %c0_i32 : i32, i32
  }
  func.func @transform_1(%arg0: i32) -> (i32, i32) {
    %c0_i32 = arith.constant 0 : i32
    %c0_i32_0 = arith.constant 0 : i32
    %c0_i32_1 = arith.constant 0 : i32
    return %c0_i32, %c0_i32_0 : i32, i32
  }
  func.func @transform_2(%arg0: i32) -> (i32, i32) {
    %c0_i32 = arith.constant 0 : i32
    %c0_i32_0 = arith.constant 0 : i32
    %c0_i32_1 = arith.constant 0 : i32
    return %c0_i32, %c0_i32_0 : i32, i32
  }
  func.func @transform_3(%arg0: i32) -> (i32, i32) {
    %c0_i32 = arith.constant 0 : i32
    %c0_i32_0 = arith.constant 0 : i32
    %c0_i32_1 = arith.constant 0 : i32
    return %c0_i32, %c0_i32_0 : i32, i32
  }
  func.func @transform_4(%arg0: i32) -> (i32, i32) {
    %c0_i32 = arith.constant 0 : i32
    %c0_i32_0 = arith.constant 0 : i32
    %c0_i32_1 = arith.constant 0 : i32
    return %c0_i32, %c0_i32_0 : i32, i32
  }
  func.func @transform_5(%arg0: i32) -> (i32, i32) {
    %c0_i32 = arith.constant 0 : i32
    %c0_i32_0 = arith.constant 0 : i32
    %c0_i32_1 = arith.constant 0 : i32
    return %c0_i32, %c0_i32_0 : i32, i32
  }
  func.func @transform_6(%arg0: i32) -> (i32, i32) {
    %c0_i32 = arith.constant 0 : i32
    %c0_i32_0 = arith.constant 0 : i32
    %c0_i32_1 = arith.constant 0 : i32
    return %c0_i32, %c0_i32_0 : i32, i32
  }
  func.func @transform_7(%arg0: i32) -> (i32, i32) {
    %c0_i32 = arith.constant 0 : i32
    %c0_i32_0 = arith.constant 0 : i32
    return %arg0, %c0_i32 : i32, i32
  }
}

</mosaic_0001>

<bundles_post_ra>
// kernel: convnet_forward.1
= control target key start
LH: loop header
LB: loop body
LE: loop exit
PB: predicated region body
PF: predicated region fallthrough
CT: control target
= control target key end

     0   :  { %12 = vsyncpa [#allocation3], 0  ;;  %s2459_s0 = inlined_call_operand.vmem [shape: f32[2,784], index: 0, kind: input, shape index: {}]   ;;  %s2460_s1 = inlined_call_operand.hbm [shape: f32[784,512], index: 1, kind: input, shape index: {}]   ;;  %s2461_s2 = inlined_call_operand.hbm [shape: f32[1,512], index: 2, kind: input, shape index: {}]   ;;  %s2462_s3 = inlined_call_operand.hbm [shape: f32[512,128], index: 3, kind: input, shape index: {}]   ;;  %s2463_s4 = inlined_call_operand.hbm [shape: f32[1,128], index: 4, kind: input, shape index: {}]   ;;  %s2464_s5 = inlined_call_operand.vmem [shape: f32[128,2], index: 5, kind: input, shape index: {}]   ;;  %s2465_s6 = inlined_call_operand.hbm [shape: f32[1,2], index: 6, kind: input, shape index: {}]   ;;  %s2466_s7 = inlined_call_operand.hbm [shape: f32[2,2], index: 7, kind: output, shape index: {}]  }
   0x1   :  { %13 = vsyncpa [#allocation6], 0 }
   0x2   :  { %14 = vsyncpa [#allocation9], 0 }
   0x3   :  { %15 = vsyncpa [#allocation4], 0  ;;  %s2223_s24 = smov [#allocation5]   ;;  %s2224_s26 = smov [#allocation8]  }
   0x4   :  { %s36_s25 = sshll.u32 %s2223_s24, 4  ;;  %s58_s27 = sshll.u32 %s2224_s26, 4  ;;  %s37_s25 = int_to_ptr.vmem [resolvable:$true] %s36_s25  ;;  %s59_s27 = int_to_ptr.vmem [resolvable:$true] %s58_s27 }
   0x5   :  { %s2083_s30 = scalar_lea.hbm %s2461_s2, 64 }
   0x6   :  { %p2084_p0 = scmp.ne.s32.totalorder %s2461_s2, %s2083_s30  ;;  %p2087_p1 = scmp.lt.u32.totalorder %s2083_s30, %s2461_s2 }
   0x8   :  { %p2089_p2 = pnand %p2087_p1, %p2084_p0 }
   0xa   :  { %2092 = shalt.err (!%p2089_p2)
}
   0xb   :  { %s2093_s12 = scalar_lea.vmem %s37_s25, 64  ;;  %p2098_p4 = scmp.lt.s32.totalorder %s37_s25, %s37_s25 }
   0xc   :  { %p2094_p3 = scmp.ne.s32.totalorder %s37_s25, %s2093_s12  ;;  %p2099_p5 = scmp.lt.s32.totalorder %s2093_s12, %s2093_s12 }
   0xe   :  { %p2100_p6 = por %p2099_p5, %p2098_p4 }
  0x10   :  { %p2101_p7 = pnand %p2100_p6, %p2094_p3 }
  0x12   :  { %2104 = shalt.err (!%p2101_p7)
}
  0x13   :  { %39 = dma.hbm_to_vmem [thread:$0]  %s2461_s2, 64, %s37_s25, [#allocation6]  }
  0x14   :  { %s2105_s17 = scalar_lea.hbm %s2463_s4, 16 }
  0x15   :  { %p2106_p8 = scmp.ne.s32.totalorder %s2463_s4, %s2105_s17  ;;  %p2109_p9 = scmp.lt.u32.totalorder %s2105_s17, %s2463_s4 }
  0x17   :  { %p2111_p10 = pnand %p2109_p9, %p2106_p8 }
  0x19   :  { %2114 = shalt.err (!%p2111_p10)
}
  0x1a   :  { %s2115_s22 = scalar_lea.vmem %s59_s27, 16  ;;  %s2119_s23 = scalar_lea.vmem %s59_s27, 32 }
  0x1b   :  { %p2116_p11 = scmp.ne.s32.totalorder %s59_s27, %s2115_s22  ;;  %p2120_p12 = scmp.lt.s32.totalorder %s59_s27, %s59_s27 }
  0x1c   :  { %p2121_p13 = scmp.lt.s32.totalorder %s2119_s23, %s2115_s22 }
  0x1e   :  { %p2122_p0 = por %p2121_p13, %p2120_p12 }
  0x20   :  { %p2123_p1 = pnand %p2122_p0, %p2116_p11 }
  0x22   :  { %2126 = shalt.err (!%p2123_p1)
}
  0x23   :  { %61 = dma.hbm_to_vmem [thread:$0]  %s2463_s4, 16, %s59_s27, [#allocation9]  }
  0x24   :  { %s2225_s25 = smov [#allocation2]   ;;  %s2127_s30 = scalar_lea.hbm %s2460_s1, 50176 }
  0x25   :  { %s23_s26 = sshll.u32 %s2225_s25, 4  ;;  %p2128_p2 = scmp.ne.s32.totalorder %s2460_s1, %s2127_s30  ;;  %s24_s26 = int_to_ptr.vmem [resolvable:$true] %s23_s26 }
  0x26   :  { %p2131_p3 = scmp.lt.u32.totalorder %s2127_s30, %s2460_s1 }
  0x28   :  { %p2133_p4 = pnand %p2131_p3, %p2128_p2 }
  0x2a   :  { %2136 = shalt.err (!%p2133_p4)
}
  0x2b   :  { %s2137_s12 = scalar_lea.vmem %s24_s26, 50176  ;;  %p2142_p6 = scmp.lt.s32.totalorder %s24_s26, %s24_s26 }
  0x2c   :  { %p2138_p5 = scmp.ne.s32.totalorder %s24_s26, %s2137_s12  ;;  %p2143_p7 = scmp.lt.s32.totalorder %s2137_s12, %s2137_s12 }
  0x2e   :  { %p2144_p8 = por %p2143_p7, %p2142_p6 }
  0x30   :  { %p2145_p9 = pnand %p2144_p8, %p2138_p5 }
  0x32   :  { %2148 = shalt.err (!%p2145_p9)
}
  0x33   :  { %s2226_s4 = smov 512   ;;  %s2227_s27 = smov 32  }
  0x34   :  { %29 = dma.hbm_to_vmem [thread:$0]  %s2460_s1, 50176, %s24_s26, [#allocation3], %s2226_s4, %s2226_s4, %s2227_s27  }
  0x35   :  { %s2228_s15 = smov [#allocation7]   ;;  %s2149_s19 = scalar_lea.hbm %s2462_s3, 8192 }
  0x36   :  { %s45_s16 = sshll.u32 %s2228_s15, 4  ;;  %p2150_p10 = scmp.ne.s32.totalorder %s2462_s3, %s2149_s19  ;;  %s46_s16 = int_to_ptr.vmem [resolvable:$true] %s45_s16 }
  0x37   :  { %p2153_p11 = scmp.lt.u32.totalorder %s2149_s19, %s2462_s3 }
  0x39   :  { %p2155_p12 = pnand %p2153_p11, %p2150_p10 }
  0x3b   :  { %2158 = shalt.err (!%p2155_p12)
}
  0x3c   :  { %s2159_s2 = scalar_lea.vmem %s46_s16, 8192  ;;  %p2164_p0 = scmp.lt.s32.totalorder %s46_s16, %s46_s16 }
  0x3d   :  { %p2160_p13 = scmp.ne.s32.totalorder %s46_s16, %s2159_s2  ;;  %p2165_p1 = scmp.lt.s32.totalorder %s2159_s2, %s2159_s2 }
  0x3f   :  { %p2166_p2 = por %p2165_p1, %p2164_p0 }
  0x41   :  { %p2167_p3 = pnand %p2166_p2, %p2160_p13 }
  0x43   :  { %2170 = shalt.err (!%p2167_p3)
}
  0x44   :  { %s2229_s1 = smov 128   ;;  %s2230_s24 = smov 8  }
  0x45   :  { %51 = dma.hbm_to_vmem [thread:$0]  %s2462_s3, 8192, %s46_s16, [#allocation6], %s2229_s1, %s2229_s1, %s2230_s24  }
  0x46   :  { %s2231_s28 = smov [#allocation10]   ;;  %s2171_s9 = scalar_lea.hbm %s2465_s6, 16 }
  0x47   :  { %s70_s29 = sshll.u32 %s2231_s28, 4  ;;  %p2172_p4 = scmp.ne.s32.totalorder %s2465_s6, %s2171_s9  ;;  %s71_s29 = int_to_ptr.vmem [resolvable:$true] %s70_s29 }
  0x48   :  { %p2175_p5 = scmp.lt.u32.totalorder %s2171_s9, %s2465_s6 }
  0x4a   :  { %p2177_p6 = pnand %p2175_p5, %p2172_p4 }
  0x4c   :  { %2180 = shalt.err (!%p2177_p6)
}
  0x4d   :  { %s2181_s27 = scalar_lea.vmem %s71_s29, 16  ;;  %s2185_s3 = scalar_lea.vmem %s71_s29, 32 }
  0x4e   :  { %p2182_p7 = scmp.ne.s32.totalorder %s71_s29, %s2181_s27  ;;  %p2186_p8 = scmp.lt.s32.totalorder %s71_s29, %s71_s29 }
  0x4f   :  { %p2187_p9 = scmp.lt.s32.totalorder %s2185_s3, %s2181_s27 }
  0x51   :  { %p2188_p10 = por %p2187_p9, %p2186_p8 }
  0x53   :  { %p2189_p11 = pnand %p2188_p10, %p2182_p7 }
  0x55   :  { %2192 = shalt.err (!%p2189_p11)
}
  0x56   :  { %73 = dma.hbm_to_vmem [thread:$0]  %s2465_s6, 16, %s71_s29, [#allocation9]  }
  0x57   :  { %2215 = dma.done.wait [#allocation3], 50176  }
  0x58   :  { %2216 = vsyncadd [#allocation3], 4294917120 }
  0x59   :  { %2217 = dma.done.wait [#allocation6], 8256  }
  0x5a   :  { %2218 = vsyncadd [#allocation6], 4294959040 }
  0x5b   :  { %2219 = dma.done.wait [#allocation9], 32  }
  0x5c   :  { %2220 = vsyncadd [#allocation9], 4294967264  ;;  %v2232_v0 = vmov 0.0   ;;  %v485_v1 = vlaneseq  ;;  %v2233_v2 = vmov 1983009808   ;;  %v92_v6 = vld [vmem:[#allocation2 + $0x8] sm:$0xff] }
  0x5d   :  { %826 = vmatprep.mubr.f32.mxu1 %v2232_v0  ;;  %v509_v3 = vunpack.c.l.s4 %v2233_v2  ;;  %v96_v7 = vld [vmem:[#allocation2 + $0x28] sm:$0xff]  ;;  %v91_v11 = vld [vmem:[#allocation2] sm:$0xff]  ;;  %v94_v22 = vld [vmem:[#allocation2 + $0x18] sm:$0xff]  ;;  %vm546_vm0 = vcmask 130048   ;;  %vm2235_vm1 = vmmov 0   ;;  %s2236_s20 = smov [#allocation11]  }
  0x5e   :  { %v2338_v4 = vshrl.u32 %v485_v1, 7  ;;  %v476_v8 = vld [vmem:[#allocation2 + $0xc08] sm:$0xff]  ;;  %v1571_v9 = vpack.c.bf16 %v96_v7, %v92_v6  ;;  %v95_v12 = vld [vmem:[#allocation2 + $0x20] sm:$0xff]  ;;  %v98_v25 = vld [vmem:[#allocation2 + $0x38] sm:$0xff]  ;;  %s1434_s21 = sshll.u32 %s2236_s20, 4  ;;  %vm1426_vm2 = vcmask 9216   ;;  %s1435_s21 = int_to_ptr.vmem [resolvable:$true] %s1434_s21 }
  0x5f   :  { %v510_v5 = vunpack.c.0.s8 %v509_v3  ;;  %v480_v10 = vld [vmem:[#allocation2 + $0xc28] sm:$0xff]  ;;  %v1573_v14 = vpack.c.bf16 %v95_v12, %v91_v11  ;;  %v475_v15 = vld [vmem:[#allocation2 + $0xc00] sm:$0xff]  ;;  %v1767_v28 = vpack.c.bf16 %v98_v25, %v94_v22  ;;  %v93_v30 = vld [vmem:[#allocation2 + $0x10] sm:$0xff]  ;;  %p2198_p13 = scmp.lt.s32.totalorder %s1435_s21, %s1435_s21 }
  0x60   :  { %v1763_v13 = vpack.c.bf16 %v480_v10, %v476_v8  ;;  %v479_v16 = vld [vmem:[#allocation2 + $0xc20] sm:$0xff]  ;;  %v100_v17 = vld [vmem:[#allocation2 + $0x48] sm:$0xff]  ;;  %1572 = vmatprep.subr.bf16.mxu0 %v1571_v9  ;;  %v97_v31 = vld [vmem:[#allocation2 + $0x30] sm:$0xff] }
  0x61   :  { %v2341_v18 = vsub.s32 %v510_v5, %v2338_v4  ;;  %v1765_v19 = vpack.c.bf16 %v479_v16, %v475_v15  ;;  %v104_v20 = vld [vmem:[#allocation2 + $0x68] sm:$0xff]  ;;  %1574 = vmatpush1.bf16.msra.mxu0 %v1573_v14  ;;  %v99_v26 = vld [vmem:[#allocation2 + $0x40] sm:$0xff]  ;;  %v1769_v34 = vpack.c.bf16 %v97_v31, %v93_v30  ;;  %v102_v36 = vld [vmem:[#allocation2 + $0x58] sm:$0xff] }
  0x62   :  { %v2346_v21 = vld [vmem:[%s2459_s0 + $0x8] sm:$0x3f]  ;;  %1764 = vmatprep.subr.bf16.mxu1 %v1763_v13  ;;  %v1575_v23 = vpack.c.bf16 %v104_v20, %v100_v17  ;;  %v103_v27 = vld [vmem:[#allocation2 + $0x60] sm:$0xff]  ;;  %v106_v37 = vld [vmem:[#allocation2 + $0x78] sm:$0xff] }
  0x63   :  { %v524_v24 = vcombine.high %v2346_v21, %v2346_v21  ;;  %1766 = vmatpush1.bf16.msra.mxu1 %v1765_v19  ;;  %v1577_v29 = vpack.c.bf16 %v103_v27, %v99_v26  ;;  %v108_v32 = vld [vmem:[#allocation2 + $0x88] sm:$0xff]  ;;  %v1771_v39 = vpack.c.bf16 %v106_v37, %v102_v36  ;;  %v107_v40 = vld [vmem:[#allocation2 + $0x80] sm:$0xff]  ;;  %v101_v42 = vld [vmem:[#allocation2 + $0x50] sm:$0xff] }
  0x64   :  { %1576 = vmatprep.subr.bf16.mxu0 %v1575_v23  ;;  %v112_v35 = vld [vmem:[#allocation2 + $0xa8] sm:$0xff]  ;;  %1768 = vmatprep.subr.bf16.mxu1 %v1767_v28  ;;  %v111_v41 = vld [vmem:[#allocation2 + $0xa0] sm:$0xff]  ;;  %v105_v44 = vld [vmem:[#allocation2 + $0x70] sm:$0xff] }
  0x65   :  { %v2351_v33 = vrot.slane %v524_v24, %v2341_v18  ;;  %v1579_v38 = vpack.c.bf16 %v112_v35, %v108_v32  ;;  %1578 = vmatpush1.bf16.msra.mxu0 %v1577_v29  ;;  %v1581_v43 = vpack.c.bf16 %v111_v41, %v107_v40  ;;  %v116_v45 = vld [vmem:[#allocation2 + $0xc8] sm:$0xff]  ;;  %v1773_v47 = vpack.c.bf16 %v105_v44, %v101_v42  ;;  %v110_v49 = vld [vmem:[#allocation2 + $0x98] sm:$0xff]  ;;  %v115_v51 = vld [vmem:[#allocation2 + $0xc0] sm:$0xff] }
  0x66   :  { %v120_v46 = vld [vmem:[#allocation2 + $0xe8] sm:$0xff]  ;;  %v114_v50 = vld [vmem:[#allocation2 + $0xb8] sm:$0xff]  ;;  %v119_v53 = vld [vmem:[#allocation2 + $0xe0] sm:$0xff] }
  0x67   :  { %1445 = vmatmul.mubr.msk.f32.vlgmr.msra.gmra.mrb[0].mxu1 %vm546_vm0, %v2351_v33  ;;  %1580 = vmatprep.subr.bf16.mxu0 %v1579_v38  ;;  %v1583_v48 = vpack.c.bf16 %v120_v46, %v116_v45  ;;  %v1775_v52 = vpack.c.bf16 %v114_v50, %v110_v49  ;;  %v109_v54 = vld [vmem:[#allocation2 + $0x90] sm:$0xff]  ;;  %v124_v56 = vld [vmem:[#allocation2 + $0x108] sm:$0xff]  ;;  %v118_v58 = vld [vmem:[#allocation2 + $0xd8] sm:$0xff]  ;;  %v1585_v59 = vpack.c.bf16 %v119_v53, %v115_v51 }
  0x68   :  { %1770 = vmatpush1.bf16.msra.mxu1 %v1769_v34  ;;  %v113_v55 = vld [vmem:[#allocation2 + $0xb0] sm:$0xff]  ;;  %v128_v57 = vld [vmem:[#allocation2 + $0x128] sm:$0xff]  ;;  %v122_v60 = vld [vmem:[#allocation2 + $0xf8] sm:$0xff] }
  0x69   :  { %1772 = vmatprep.subr.bf16.mxu1 %v1771_v39  ;;  %1582 = vmatpush1.bf16.msra.mxu0 %v1581_v43  ;;  %v1777_v61 = vpack.c.bf16 %v113_v55, %v109_v54  ;;  %v1587_v62 = vpack.c.bf16 %v128_v57, %v124_v56  ;;  %v123_v63 = vld [vmem:[#allocation2 + $0x100] sm:$0xff]  ;;  %v117_v2 = vld [vmem:[#allocation2 + $0xd0] sm:$0xff]  ;;  %v1779_v3 = vpack.c.bf16 %v122_v60, %v118_v58  ;;  %v132_v6 = vld [vmem:[#allocation2 + $0x148] sm:$0xff] }
  0x6a   :  { %1584 = vmatprep.subr.bf16.mxu0 %v1583_v48  ;;  %v127_v1 = vld [vmem:[#allocation2 + $0x120] sm:$0xff]  ;;  %v121_v5 = vld [vmem:[#allocation2 + $0xf0] sm:$0xff]  ;;  %v136_v7 = vld [vmem:[#allocation2 + $0x168] sm:$0xff] }
  0x6b   :  { %v126_v8 = vld [vmem:[#allocation2 + $0x118] sm:$0xff]  ;;  %v1589_v10 = vpack.c.bf16 %v127_v1, %v123_v63  ;;  %v1781_v11 = vpack.c.bf16 %v121_v5, %v117_v2  ;;  %v1591_v12 = vpack.c.bf16 %v136_v7, %v132_v6  ;;  %v131_v13 = vld [vmem:[#allocation2 + $0x140] sm:$0xff]  ;;  %v125_v15 = vld [vmem:[#allocation2 + $0x110] sm:$0xff] }
  0x6c   :  { %1774 = vmatpush1.bf16.msra.mxu1 %v1773_v47  ;;  %v130_v9 = vld [vmem:[#allocation2 + $0x138] sm:$0xff]  ;;  %v135_v14 = vld [vmem:[#allocation2 + $0x160] sm:$0xff]  ;;  %v129_v17 = vld [vmem:[#allocation2 + $0x130] sm:$0xff] }
  0x6d   :  { %1776 = vmatprep.subr.bf16.mxu1 %v1775_v52  ;;  %1586 = vmatpush1.bf16.msra.mxu0 %v1585_v59  ;;  %v1783_v16 = vpack.c.bf16 %v130_v9, %v126_v8  ;;  %v140_v19 = vld [vmem:[#allocation2 + $0x188] sm:$0xff]  ;;  %v134_v22 = vld [vmem:[#allocation2 + $0x158] sm:$0xff]  ;;  %v1593_v24 = vpack.c.bf16 %v135_v14, %v131_v13  ;;  %v1785_v25 = vpack.c.bf16 %v129_v17, %v125_v15  ;;  %v139_v27 = vld [vmem:[#allocation2 + $0x180] sm:$0xff] }
  0x6e   :  { %1588 = vmatprep.subr.bf16.mxu0 %v1587_v62  ;;  %v144_v20 = vld [vmem:[#allocation2 + $0x1a8] sm:$0xff]  ;;  %v138_v23 = vld [vmem:[#allocation2 + $0x178] sm:$0xff]  ;;  %v143_v28 = vld [vmem:[#allocation2 + $0x1a0] sm:$0xff] }
  0x6f   :  { %v1595_v26 = vpack.c.bf16 %v144_v20, %v140_v19  ;;  %v133_v29 = vld [vmem:[#allocation2 + $0x150] sm:$0xff]  ;;  %v1787_v30 = vpack.c.bf16 %v138_v23, %v134_v22  ;;  %v148_v32 = vld [vmem:[#allocation2 + $0x1c8] sm:$0xff]  ;;  %v142_v35 = vld [vmem:[#allocation2 + $0x198] sm:$0xff]  ;;  %v1597_v37 = vpack.c.bf16 %v143_v28, %v139_v27 }
  0x70   :  { %1778 = vmatpush1.bf16.msra.mxu1 %v1777_v61  ;;  %v137_v31 = vld [vmem:[#allocation2 + $0x170] sm:$0xff]  ;;  %v152_v34 = vld [vmem:[#allocation2 + $0x1e8] sm:$0xff]  ;;  %v146_v36 = vld [vmem:[#allocation2 + $0x1b8] sm:$0xff] }
  0x71   :  { %1780 = vmatprep.subr.bf16.mxu1 %v1779_v3  ;;  %1590 = vmatpush1.bf16.msra.mxu0 %v1589_v10  ;;  %v1789_v38 = vpack.c.bf16 %v137_v31, %v133_v29  ;;  %v1599_v39 = vpack.c.bf16 %v152_v34, %v148_v32  ;;  %v147_v40 = vld [vmem:[#allocation2 + $0x1c0] sm:$0xff]  ;;  %v141_v42 = vld [vmem:[#allocation2 + $0x190] sm:$0xff]  ;;  %v1791_v43 = vpack.c.bf16 %v146_v36, %v142_v35  ;;  %v156_v45 = vld [vmem:[#allocation2 + $0x208] sm:$0xff] }
  0x72   :  { %1592 = vmatprep.subr.bf16.mxu0 %v1591_v12  ;;  %v151_v41 = vld [vmem:[#allocation2 + $0x1e0] sm:$0xff]  ;;  %v145_v44 = vld [vmem:[#allocation2 + $0x1b0] sm:$0xff]  ;;  %v160_v46 = vld [vmem:[#allocation2 + $0x228] sm:$0xff] }
  0x73   :  { %v150_v47 = vld [vmem:[#allocation2 + $0x1d8] sm:$0xff]  ;;  %v1601_v49 = vpack.c.bf16 %v151_v41, %v147_v40  ;;  %v1793_v50 = vpack.c.bf16 %v145_v44, %v141_v42  ;;  %v1603_v51 = vpack.c.bf16 %v160_v46, %v156_v45  ;;  %v155_v52 = vld [vmem:[#allocation2 + $0x200] sm:$0xff]  ;;  %v149_v54 = vld [vmem:[#allocation2 + $0x1d0] sm:$0xff] }
  0x74   :  { %1782 = vmatpush1.bf16.msra.mxu1 %v1781_v11  ;;  %v154_v48 = vld [vmem:[#allocation2 + $0x1f8] sm:$0xff]  ;;  %v159_v53 = vld [vmem:[#allocation2 + $0x220] sm:$0xff]  ;;  %v153_v56 = vld [vmem:[#allocation2 + $0x1f0] sm:$0xff] }
  0x75   :  { %1784 = vmatprep.subr.bf16.mxu1 %v1783_v16  ;;  %1594 = vmatpush1.bf16.msra.mxu0 %v1593_v24  ;;  %v1795_v55 = vpack.c.bf16 %v154_v48, %v150_v47  ;;  %v164_v57 = vld [vmem:[#allocation2 + $0x248] sm:$0xff]  ;;  %v158_v59 = vld [vmem:[#allocation2 + $0x218] sm:$0xff]  ;;  %v1605_v61 = vpack.c.bf16 %v159_v53, %v155_v52  ;;  %v1797_v62 = vpack.c.bf16 %v153_v56, %v149_v54  ;;  %v163_v1 = vld [vmem:[#allocation2 + $0x240] sm:$0xff] }
  0x76   :  { %1596 = vmatprep.subr.bf16.mxu0 %v1595_v26  ;;  %v168_v58 = vld [vmem:[#allocation2 + $0x268] sm:$0xff]  ;;  %v162_v60 = vld [vmem:[#allocation2 + $0x238] sm:$0xff]  ;;  %v167_v2 = vld [vmem:[#allocation2 + $0x260] sm:$0xff] }
  0x77   :  { %v1607_v63 = vpack.c.bf16 %v168_v58, %v164_v57  ;;  %v157_v3 = vld [vmem:[#allocation2 + $0x210] sm:$0xff]  ;;  %v1799_v5 = vpack.c.bf16 %v162_v60, %v158_v59  ;;  %v172_v7 = vld [vmem:[#allocation2 + $0x288] sm:$0xff]  ;;  %v166_v9 = vld [vmem:[#allocation2 + $0x258] sm:$0xff]  ;;  %v1609_v11 = vpack.c.bf16 %v167_v2, %v163_v1 }
  0x78   :  { %1786 = vmatpush1.bf16.msra.mxu1 %v1785_v25  ;;  %v161_v6 = vld [vmem:[#allocation2 + $0x230] sm:$0xff]  ;;  %v176_v8 = vld [vmem:[#allocation2 + $0x2a8] sm:$0xff]  ;;  %v170_v10 = vld [vmem:[#allocation2 + $0x278] sm:$0xff] }
  0x79   :  { %1788 = vmatprep.subr.bf16.mxu1 %v1787_v30  ;;  %1598 = vmatpush1.bf16.msra.mxu0 %v1597_v37  ;;  %v1801_v12 = vpack.c.bf16 %v161_v6, %v157_v3  ;;  %v1611_v13 = vpack.c.bf16 %v176_v8, %v172_v7  ;;  %v171_v14 = vld [vmem:[#allocation2 + $0x280] sm:$0xff]  ;;  %v165_v16 = vld [vmem:[#allocation2 + $0x250] sm:$0xff]  ;;  %v1803_v17 = vpack.c.bf16 %v170_v10, %v166_v9  ;;  %v180_v20 = vld [vmem:[#allocation2 + $0x2c8] sm:$0xff] }
  0x7a   :  { %1600 = vmatprep.subr.bf16.mxu0 %v1599_v39  ;;  %v175_v15 = vld [vmem:[#allocation2 + $0x2a0] sm:$0xff]  ;;  %v169_v19 = vld [vmem:[#allocation2 + $0x270] sm:$0xff]  ;;  %v184_v22 = vld [vmem:[#allocation2 + $0x2e8] sm:$0xff] }
  0x7b   :  { %v174_v23 = vld [vmem:[#allocation2 + $0x298] sm:$0xff]  ;;  %v1613_v25 = vpack.c.bf16 %v175_v15, %v171_v14  ;;  %v1805_v26 = vpack.c.bf16 %v169_v19, %v165_v16  ;;  %v1615_v27 = vpack.c.bf16 %v184_v22, %v180_v20  ;;  %v179_v28 = vld [vmem:[#allocation2 + $0x2c0] sm:$0xff]  ;;  %v173_v30 = vld [vmem:[#allocation2 + $0x290] sm:$0xff] }
  0x7c   :  { %1790 = vmatpush1.bf16.msra.mxu1 %v1789_v38  ;;  %v178_v24 = vld [vmem:[#allocation2 + $0x2b8] sm:$0xff]  ;;  %v183_v29 = vld [vmem:[#allocation2 + $0x2e0] sm:$0xff]  ;;  %v177_v32 = vld [vmem:[#allocation2 + $0x2b0] sm:$0xff] }
  0x7d   :  { %1792 = vmatprep.subr.bf16.mxu1 %v1791_v43  ;;  %1602 = vmatpush1.bf16.msra.mxu0 %v1601_v49  ;;  %v1807_v31 = vpack.c.bf16 %v178_v24, %v174_v23  ;;  %v188_v34 = vld [vmem:[#allocation2 + $0x308] sm:$0xff]  ;;  %v182_v36 = vld [vmem:[#allocation2 + $0x2d8] sm:$0xff]  ;;  %v2358_v38 = vld [vmem:[%s2459_s0] sm:$0xff]  ;;  %v1617_v39 = vpack.c.bf16 %v183_v29, %v179_v28  ;;  %v1809_v41 = vpack.c.bf16 %v177_v32, %v173_v30 }
  0x7e   :  { %1604 = vmatprep.subr.bf16.mxu0 %v1603_v51  ;;  %v192_v35 = vld [vmem:[#allocation2 + $0x328] sm:$0xff]  ;;  %v186_v37 = vld [vmem:[#allocation2 + $0x2f8] sm:$0xff]  ;;  %v2362_v40 = vrot.slane %v2358_v38, %v2341_v18  ;;  %v187_v43 = vld [vmem:[#allocation2 + $0x300] sm:$0xff]  ;;  %v507_v16 = vcombine.high %v2358_v38, %v2358_v38 }
  0x7f   :  { %v1619_v42 = vpack.c.bf16 %v192_v35, %v188_v34  ;;  %v191_v44 = vld [vmem:[#allocation2 + $0x320] sm:$0xff]  ;;  %v181_v45 = vld [vmem:[#allocation2 + $0x2d0] sm:$0xff]  ;;  %v1811_v46 = vpack.c.bf16 %v186_v37, %v182_v36  ;;  %v196_v48 = vld [vmem:[#allocation2 + $0x348] sm:$0xff] }
  0x80   :  { %1794 = vmatpush1.bf16.msra.mxu1 %v1793_v50  ;;  %v185_v47 = vld [vmem:[#allocation2 + $0x2f0] sm:$0xff]  ;;  %v200_v49 = vld [vmem:[#allocation2 + $0x368] sm:$0xff]  ;;  %v522_v50 = vcombine.high %v2362_v40, %v2362_v40  ;;  %v190_v51 = vld [vmem:[#allocation2 + $0x318] sm:$0xff]  ;;  %v1621_v53 = vpack.c.bf16 %v191_v44, %v187_v43 }
  0x81   :  { %1796 = vmatprep.subr.bf16.mxu1 %v1795_v55  ;;  %1606 = vmatpush1.bf16.msra.mxu0 %v1605_v61  ;;  %v194_v52 = vld [vmem:[#allocation2 + $0x338] sm:$0xff]  ;;  %v1813_v54 = vpack.c.bf16 %v185_v47, %v181_v45  ;;  %v1623_v55 = vpack.c.bf16 %v200_v49, %v196_v48  ;;  %v195_v56 = vld [vmem:[#allocation2 + $0x340] sm:$0xff]  ;;  %v189_v58 = vld [vmem:[#allocation2 + $0x310] sm:$0xff]  ;;  %v2373_v45 = vrot.slane %v2346_v21, %v2341_v18 }
  0x82   :  { %1608 = vmatprep.subr.bf16.mxu0 %v1607_v63  ;;  %613 = vmatprep.mubr.f32.mxu0 %v522_v50  ;;  %v199_v57 = vld [vmem:[#allocation2 + $0x360] sm:$0xff]  ;;  %v1815_v59 = vpack.c.bf16 %v194_v52, %v190_v51  ;;  %v193_v60 = vld [vmem:[#allocation2 + $0x330] sm:$0xff]  ;;  %v204_v61 = vld [vmem:[#allocation2 + $0x388] sm:$0xff] }
  0x83   :  { %897 = vmatprep.mubr.f32.mxu1 %v522_v50  ;;  %v198_v63 = vld [vmem:[#allocation2 + $0x358] sm:$0xff]  ;;  %v1625_v2 = vpack.c.bf16 %v199_v57, %v195_v56  ;;  %v1817_v3 = vpack.c.bf16 %v193_v60, %v189_v58  ;;  %v203_v6 = vld [vmem:[#allocation2 + $0x380] sm:$0xff]  ;;  %v197_v8 = vld [vmem:[#allocation2 + $0x350] sm:$0xff] }
  0x84   :  { %1798 = vmatpush1.bf16.msra.mxu1 %v1797_v62  ;;  %v208_v62 = vld [vmem:[#allocation2 + $0x3a8] sm:$0xff]  ;;  %v202_v1 = vld [vmem:[#allocation2 + $0x378] sm:$0xff]  ;;  %v207_v7 = vld [vmem:[#allocation2 + $0x3a0] sm:$0xff] }
  0x85   :  { %1800 = vmatprep.subr.bf16.mxu1 %v1799_v5  ;;  %1610 = vmatpush1.bf16.msra.mxu0 %v1609_v11  ;;  %v1627_v5 = vpack.c.bf16 %v208_v62, %v204_v61  ;;  %v1819_v9 = vpack.c.bf16 %v202_v1, %v198_v63  ;;  %v201_v10 = vld [vmem:[#allocation2 + $0x370] sm:$0xff]  ;;  %v212_v11 = vld [vmem:[#allocation2 + $0x3c8] sm:$0xff]  ;;  %v210_v14 = vld [vmem:[#allocation2 + $0x3b8] sm:$0xff]  ;;  %v1629_v15 = vpack.c.bf16 %v207_v7, %v203_v6 }
  0x86   :  { %1612 = vmatprep.subr.bf16.mxu0 %v1611_v13  ;;  %v206_v13 = vld [vmem:[#allocation2 + $0x398] sm:$0xff]  ;;  %v211_v20 = vld [vmem:[#allocation2 + $0x3c0] sm:$0xff]  ;;  %v205_v23 = vld [vmem:[#allocation2 + $0x390] sm:$0xff] }
  0x87   :  { %v215_v22 = vld [vmem:[#allocation2 + $0x3e0] sm:$0xff]  ;;  %v1823_v24 = vpack.c.bf16 %v210_v14, %v206_v13  ;;  %v214_v28 = vld [vmem:[#allocation2 + $0x3d8] sm:$0xff]  ;;  %v213_v37 = vld [vmem:[#allocation2 + $0x3d0] sm:$0xff] }
  0x88   :  { %1802 = vmatpush1.bf16.msra.mxu1 %v1801_v12  ;;  %v216_v12 = vld [vmem:[#allocation2 + $0x3e8] sm:$0xff]  ;;  %v218_v29 = vld [vmem:[#allocation2 + $0x3f8] sm:$0xff]  ;;  %v1633_v30 = vpack.c.bf16 %v215_v22, %v211_v20  ;;  %v219_v35 = vld [vmem:[#allocation2 + $0x400] sm:$0xff] }
  0x89   :  { %1804 = vmatprep.subr.bf16.mxu1 %v1803_v17  ;;  %1614 = vmatpush1.bf16.msra.mxu0 %v1613_v25  ;;  %v1821_v17 = vpack.c.bf16 %v201_v10, %v197_v8  ;;  %v1631_v19 = vpack.c.bf16 %v216_v12, %v212_v11  ;;  %v209_v25 = vld [vmem:[#allocation2 + $0x3b0] sm:$0xff]  ;;  %v223_v36 = vld [vmem:[#allocation2 + $0x420] sm:$0xff]  ;;  %v1827_v38 = vpack.c.bf16 %v218_v29, %v214_v28  ;;  %v222_v43 = vld [vmem:[#allocation2 + $0x418] sm:$0xff] }
  0x8a   :  { %1616 = vmatprep.subr.bf16.mxu0 %v1615_v27  ;;  %v224_v27 = vld [vmem:[#allocation2 + $0x428] sm:$0xff]  ;;  %v1825_v32 = vpack.c.bf16 %v209_v25, %v205_v23  ;;  %v226_v44 = vld [vmem:[#allocation2 + $0x438] sm:$0xff]  ;;  %v227_v50 = vld [vmem:[#allocation2 + $0x440] sm:$0xff] }
  0x8b   :  { %v231_v51 = vld [vmem:[#allocation2 + $0x460] sm:$0xff]  ;;  %v221_v52 = vld [vmem:[#allocation2 + $0x410] sm:$0xff]  ;;  %v240_v56 = vld [vmem:[#allocation2 + $0x4a8] sm:$0xff] }
  0x8c   :  { %1806 = vmatpush1.bf16.msra.mxu1 %v1805_v26  ;;  %v220_v26 = vld [vmem:[#allocation2 + $0x408] sm:$0xff]  ;;  %v234_v21 = vld [vmem:[#allocation2 + $0x478] sm:$0xff]  ;;  %v1641_v57 = vpack.c.bf16 %v231_v51, %v227_v50  ;;  %v235_v60 = vld [vmem:[#allocation2 + $0x480] sm:$0xff] }
  0x8d   :  { %1808 = vmatprep.subr.bf16.mxu1 %v1807_v31  ;;  %1618 = vmatpush1.bf16.msra.mxu0 %v1617_v39  ;;  %v2369_v31 = vrot.slane %v507_v16, %v2341_v18  ;;  %v1635_v34 = vpack.c.bf16 %v224_v27, %v220_v26  ;;  %v217_v39 = vld [vmem:[#allocation2 + $0x3f0] sm:$0xff]  ;;  %v230_v18 = vld [vmem:[#allocation2 + $0x458] sm:$0xff]  ;;  %v239_v61 = vld [vmem:[#allocation2 + $0x4a0] sm:$0xff] }
  0x8e   :  { %1620 = vmatprep.subr.bf16.mxu0 %v1619_v42  ;;  %v232_v42 = vld [vmem:[#allocation2 + $0x468] sm:$0xff]  ;;  %v1829_v48 = vpack.c.bf16 %v217_v39, %v213_v37  ;;  %v229_v62 = vld [vmem:[#allocation2 + $0x450] sm:$0xff]  ;;  %v1835_v63 = vpack.c.bf16 %v234_v21, %v230_v18  ;;  %v242_v6 = vld [vmem:[#allocation2 + $0x4b8] sm:$0xff]  ;;  %v1645_v7 = vpack.c.bf16 %v239_v61, %v235_v60 }
  0x8f   :  { %v523_v47 = vcombine.high %v2369_v31, %v2369_v31  ;;  %v233_v1 = vld [vmem:[#allocation2 + $0x470] sm:$0xff]  ;;  %v243_v10 = vld [vmem:[#allocation2 + $0x4c0] sm:$0xff]  ;;  %v256_v16 = vld [vmem:[#allocation2 + $0x528] sm:$0xff] }
  0x90   :  { %1810 = vmatpush1.bf16.msra.mxu1 %v1809_v41  ;;  %v228_v41 = vld [vmem:[#allocation2 + $0x448] sm:$0xff]  ;;  %v1837_v8 = vpack.c.bf16 %v233_v1, %v229_v62  ;;  %v247_v11 = vld [vmem:[#allocation2 + $0x4e0] sm:$0xff]  ;;  %v237_v12 = vld [vmem:[#allocation2 + $0x490] sm:$0xff] }
  0x91   :  { %1812 = vmatprep.subr.bf16.mxu1 %v1811_v46  ;;  %1622 = vmatpush1.bf16.msra.mxu0 %v1621_v53  ;;  %v1637_v46 = vpack.c.bf16 %v223_v36, %v219_v35  ;;  %v1639_v49 = vpack.c.bf16 %v232_v42, %v228_v41  ;;  %v1831_v53 = vpack.c.bf16 %v226_v44, %v222_v43  ;;  %v241_v14 = vld [vmem:[#allocation2 + $0x4b0] sm:$0xff]  ;;  %v251_v23 = vld [vmem:[#allocation2 + $0x500] sm:$0xff]  ;;  %v260_v28 = vld [vmem:[#allocation2 + $0x548] sm:$0xff] }
  0x92   :  { %1624 = vmatprep.subr.bf16.mxu0 %v1623_v55  ;;  %v236_v55 = vld [vmem:[#allocation2 + $0x488] sm:$0xff]  ;;  %v1649_v20 = vpack.c.bf16 %v247_v11, %v243_v10  ;;  %v245_v25 = vld [vmem:[#allocation2 + $0x4d0] sm:$0xff]  ;;  %v259_v37 = vld [vmem:[#allocation2 + $0x540] sm:$0xff] }
  0x93   :  { %v249_v27 = vld [vmem:[#allocation2 + $0x4f0] sm:$0xff]  ;;  %v264_v29 = vld [vmem:[#allocation2 + $0x568] sm:$0xff]  ;;  %v267_v51 = vld [vmem:[#allocation2 + $0x580] sm:$0xff] }
  0x94   :  { %1814 = vmatpush1.bf16.msra.mxu1 %v1813_v54  ;;  %v225_v54 = vld [vmem:[#allocation2 + $0x430] sm:$0xff]  ;;  %v1845_v35 = vpack.c.bf16 %v249_v27, %v245_v25  ;;  %v1655_v36 = vpack.c.bf16 %v264_v29, %v260_v28  ;;  %v268_v43 = vld [vmem:[#allocation2 + $0x588] sm:$0xff]  ;;  %v270_v21 = vld [vmem:[#allocation2 + $0x598] sm:$0xff] }
  0x95   :  { %1816 = vmatprep.subr.bf16.mxu1 %v1815_v59  ;;  %1626 = vmatpush1.bf16.msra.mxu0 %v1625_v2  ;;  %v1833_v58 = vpack.c.bf16 %v225_v54, %v221_v52  ;;  %v1643_v59 = vpack.c.bf16 %v240_v56, %v236_v55  ;;  %v244_v2 = vld [vmem:[#allocation2 + $0x4c8] sm:$0xff]  ;;  %v253_v39 = vld [vmem:[#allocation2 + $0x510] sm:$0xff]  ;;  %v271_v52 = vld [vmem:[#allocation2 + $0x5a0] sm:$0xff] }
  0x96   :  { %1628 = vmatprep.subr.bf16.mxu0 %v1627_v5  ;;  %v238_v5 = vld [vmem:[#allocation2 + $0x498] sm:$0xff]  ;;  %v257_v42 = vld [vmem:[#allocation2 + $0x530] sm:$0xff]  ;;  %v272_v44 = vld [vmem:[#allocation2 + $0x5a8] sm:$0xff] }
  0x97   :  { %v1839_v13 = vpack.c.bf16 %v242_v6, %v238_v5  ;;  %v1659_v50 = vpack.c.bf16 %v272_v44, %v268_v43  ;;  %v265_v55 = vld [vmem:[#allocation2 + $0x570] sm:$0xff]  ;;  %v276_v56 = vld [vmem:[#allocation2 + $0x5c8] sm:$0xff]  ;;  %v275_v61 = vld [vmem:[#allocation2 + $0x5c0] sm:$0xff] }
  0x98   :  { %1818 = vmatpush1.bf16.msra.mxu1 %v1817_v3  ;;  %v248_v3 = vld [vmem:[#allocation2 + $0x4e8] sm:$0xff]  ;;  %v279_v62 = vld [vmem:[#allocation2 + $0x5e0] sm:$0xff]  ;;  %v278_v6 = vld [vmem:[#allocation2 + $0x5d8] sm:$0xff] }
  0x99   :  { %1820 = vmatprep.subr.bf16.mxu1 %v1819_v9  ;;  %1630 = vmatpush1.bf16.msra.mxu0 %v1629_v15  ;;  %v1647_v9 = vpack.c.bf16 %v248_v3, %v244_v2  ;;  %v252_v15 = vld [vmem:[#allocation2 + $0x508] sm:$0xff]  ;;  %v273_v2 = vld [vmem:[#allocation2 + $0x5b0] sm:$0xff]  ;;  %v283_v11 = vld [vmem:[#allocation2 + $0x600] sm:$0xff] }
  0x9a   :  { %1632 = vmatprep.subr.bf16.mxu0 %v1631_v19  ;;  %v250_v19 = vld [vmem:[#allocation2 + $0x4f8] sm:$0xff]  ;;  %v1651_v22 = vpack.c.bf16 %v256_v16, %v252_v15  ;;  %v280_v18 = vld [vmem:[#allocation2 + $0x5e8] sm:$0xff]  ;;  %v281_v15 = vld [vmem:[#allocation2 + $0x5f0] sm:$0xff] }
  0x9b   :  { %v1663_v60 = vpack.c.bf16 %v280_v18, %v276_v56  ;;  %v284_v3 = vld [vmem:[#allocation2 + $0x608] sm:$0xff]  ;;  %v295_v25 = vld [vmem:[#allocation2 + $0x660] sm:$0xff]  ;;  %v289_v28 = vld [vmem:[#allocation2 + $0x630] sm:$0xff] }
  0x9c   :  { %1822 = vmatpush1.bf16.msra.mxu1 %v1821_v17  ;;  %v246_v17 = vld [vmem:[#allocation2 + $0x4d8] sm:$0xff]  ;;  %v288_v5 = vld [vmem:[#allocation2 + $0x628] sm:$0xff]  ;;  %v297_v43 = vld [vmem:[#allocation2 + $0x670] sm:$0xff] }
  0x9d   :  { %1824 = vmatprep.subr.bf16.mxu1 %v1823_v24  ;;  %1634 = vmatpush1.bf16.msra.mxu0 %v1633_v30  ;;  %v255_v24 = vld [vmem:[#allocation2 + $0x520] sm:$0xff]  ;;  %v1843_v26 = vpack.c.bf16 %v250_v19, %v246_v17  ;;  %v254_v30 = vld [vmem:[#allocation2 + $0x518] sm:$0xff]  ;;  %v1667_v10 = vpack.c.bf16 %v288_v5, %v284_v3  ;;  %v292_v16 = vld [vmem:[#allocation2 + $0x648] sm:$0xff] }
  0x9e   :  { %1636 = vmatprep.subr.bf16.mxu0 %v1635_v34  ;;  %v1653_v34 = vpack.c.bf16 %v255_v24, %v251_v23  ;;  %v296_v17 = vld [vmem:[#allocation2 + $0x668] sm:$0xff]  ;;  %v286_v19 = vld [vmem:[#allocation2 + $0x618] sm:$0xff]  ;;  %v291_v24 = vld [vmem:[#allocation2 + $0x640] sm:$0xff] }
  0x9f   :  { %v1671_v23 = vpack.c.bf16 %v296_v17, %v292_v16  ;;  %v300_v29 = vld [vmem:[#allocation2 + $0x688] sm:$0xff]  ;;  %v305_v56 = vld [vmem:[#allocation2 + $0x6b0] sm:$0xff] }
  0xa0   :  { %1826 = vmatpush1.bf16.msra.mxu1 %v1825_v32  ;;  %614 = vmatmul.mubr.f32.vlgmr.msra.gmra.mrb[0].mxu0 %v2362_v40  ;;  %v258_v32 = vld [vmem:[#allocation2 + $0x538] sm:$0xff]  ;;  %v308_v44 = vld [vmem:[#allocation2 + $0x6c8] sm:$0xff]  ;;  %v313_v3 = vld [vmem:[#allocation2 + $0x6f0] sm:$0xff] }
  0xa1   :  { %1828 = vmatprep.subr.bf16.mxu1 %v1827_v38  ;;  %1638 = vmatpush1.bf16.msra.mxu0 %v1637_v46  ;;  %v263_v38 = vld [vmem:[#allocation2 + $0x560] sm:$0xff]  ;;  %v1847_v41 = vpack.c.bf16 %v258_v32, %v254_v30  ;;  %v262_v46 = vld [vmem:[#allocation2 + $0x558] sm:$0xff]  ;;  %v304_v30 = vld [vmem:[#allocation2 + $0x6a8] sm:$0xff] }
  0xa2   :  { %684 = vmatprep.mubr.f32.mxu0 %v523_v47  ;;  %1640 = vmatprep.subr.bf16.mxu0 %v1639_v49  ;;  %v1849_v49 = vpack.c.bf16 %v257_v42, %v253_v39  ;;  %v294_v32 = vld [vmem:[#allocation2 + $0x658] sm:$0xff]  ;;  %v303_v39 = vld [vmem:[#allocation2 + $0x6a0] sm:$0xff]  ;;  %v316_v18 = vld [vmem:[#allocation2 + $0x708] sm:$0xff] }
  0xa3   :  { %v324_v5 = vld [vmem:[#allocation2 + $0x748] sm:$0xff]  ;;  %v321_v16 = vld [vmem:[#allocation2 + $0x730] sm:$0xff] }
  0xa4   :  { %1830 = vmatpush1.bf16.msra.mxu1 %v1829_v48  ;;  %v1657_v48 = vpack.c.bf16 %v263_v38, %v259_v37  ;;  %v1675_v37 = vpack.c.bf16 %v304_v30, %v300_v29  ;;  %v299_v38 = vld [vmem:[#allocation2 + $0x680] sm:$0xff]  ;;  %v332_v17 = vld [vmem:[#allocation2 + $0x788] sm:$0xff]  ;;  %v329_v29 = vld [vmem:[#allocation2 + $0x770] sm:$0xff] }
  0xa5   :  { %1832 = vmatprep.subr.bf16.mxu1 %v1831_v53  ;;  %1642 = vmatpush1.bf16.msra.mxu0 %v1641_v57  ;;  %v261_v53 = vld [vmem:[#allocation2 + $0x550] sm:$0xff]  ;;  %v274_v57 = vld [vmem:[#allocation2 + $0x5b8] sm:$0xff]  ;;  %v340_v30 = vld [vmem:[#allocation2 + $0x7c8] sm:$0xff] }
  0xa6   :  { %1644 = vmatprep.subr.bf16.mxu0 %v1643_v59  ;;  %v1853_v59 = vpack.c.bf16 %v265_v55, %v261_v53  ;;  %v1855_v1 = vpack.c.bf16 %v274_v57, %v270_v21  ;;  %v311_v53 = vld [vmem:[#allocation2 + $0x6e0] sm:$0xff]  ;;  %v320_v21 = vld [vmem:[#allocation2 + $0x728] sm:$0xff]  ;;  %v310_v57 = vld [vmem:[#allocation2 + $0x6d8] sm:$0xff] }
  0xa7   :  { %898 = vmatmul.mubr.f32.vlgmr.msra.gmra.mrb[2].mxu1 %v2362_v40  ;;  %v1841_v40 = vpack.c.bf16 %v241_v14, %v237_v12  ;;  %v287_v12 = vld [vmem:[#allocation2 + $0x620] sm:$0xff] }
  0xa8   :  { %1834 = vmatpush1.bf16.msra.mxu1 %v1833_v58  ;;  %968 = vmatprep.mubr.f32.mxu1 %v523_v47  ;;  %v266_v47 = vld [vmem:[#allocation2 + $0x578] sm:$0xff]  ;;  %v1661_v58 = vpack.c.bf16 %v271_v52, %v267_v51  ;;  %v307_v52 = vld [vmem:[#allocation2 + $0x6c0] sm:$0xff] }
  0xa9   :  { %1836 = vmatprep.subr.bf16.mxu1 %v1835_v63  ;;  %1646 = vmatpush1.bf16.msra.mxu0 %v1645_v7  ;;  %v1851_v54 = vpack.c.bf16 %v266_v47, %v262_v46  ;;  %v269_v63 = vld [vmem:[#allocation2 + $0x590] sm:$0xff]  ;;  %v282_v7 = vld [vmem:[#allocation2 + $0x5f8] sm:$0xff]  ;;  %v312_v46 = vld [vmem:[#allocation2 + $0x6e8] sm:$0xff] }
  0xaa   :  { %1648 = vmatprep.subr.bf16.mxu0 %v1647_v9  ;;  %v1857_v9 = vpack.c.bf16 %v273_v2, %v269_v63  ;;  %v1859_v14 = vpack.c.bf16 %v282_v7, %v278_v6  ;;  %v302_v47 = vld [vmem:[#allocation2 + $0x698] sm:$0xff]  ;;  %v1679_v51 = vpack.c.bf16 %v312_v46, %v308_v44  ;;  %v319_v63 = vld [vmem:[#allocation2 + $0x720] sm:$0xff]  ;;  %v328_v6 = vld [vmem:[#allocation2 + $0x768] sm:$0xff] }
  0xab   :  { %v318_v7 = vld [vmem:[#allocation2 + $0x718] sm:$0xff]  ;;  %v337_v44 = vld [vmem:[#allocation2 + $0x7b0] sm:$0xff]  ;;  %v348_v46 = vld [vmem:[#allocation2 + $0x808] sm:$0xff] }
  0xac   :  { %1838 = vmatpush1.bf16.msra.mxu1 %v1837_v8  ;;  %v1665_v8 = vpack.c.bf16 %v279_v62, %v275_v61  ;;  %v1683_v61 = vpack.c.bf16 %v320_v21, %v316_v18  ;;  %v315_v62 = vld [vmem:[#allocation2 + $0x700] sm:$0xff]  ;;  %v345_v18 = vld [vmem:[#allocation2 + $0x7f0] sm:$0xff]  ;;  %v356_v21 = vld [vmem:[#allocation2 + $0x848] sm:$0xff] }
  0xad   :  { %1840 = vmatprep.subr.bf16.mxu1 %v1839_v13  ;;  %1650 = vmatpush1.bf16.msra.mxu0 %v1649_v20  ;;  %v277_v13 = vld [vmem:[#allocation2 + $0x5d0] sm:$0xff]  ;;  %v290_v20 = vld [vmem:[#allocation2 + $0x638] sm:$0xff] }
  0xae   :  { %1652 = vmatprep.subr.bf16.mxu0 %v1651_v22  ;;  %v1861_v22 = vpack.c.bf16 %v281_v15, %v277_v13  ;;  %v1863_v27 = vpack.c.bf16 %v290_v20, %v286_v19  ;;  %v327_v13 = vld [vmem:[#allocation2 + $0x760] sm:$0xff]  ;;  %v336_v19 = vld [vmem:[#allocation2 + $0x7a8] sm:$0xff]  ;;  %v326_v20 = vld [vmem:[#allocation2 + $0x758] sm:$0xff] }
  0xb0   :  { %1842 = vmatpush1.bf16.msra.mxu1 %v1841_v40  ;;  %v1669_v40 = vpack.c.bf16 %v287_v12, %v283_v11  ;;  %v1687_v11 = vpack.c.bf16 %v328_v6, %v324_v5  ;;  %v323_v12 = vld [vmem:[#allocation2 + $0x740] sm:$0xff]  ;;  %v353_v6 = vld [vmem:[#allocation2 + $0x830] sm:$0xff] }
  0xb1   :  { %1844 = vmatprep.subr.bf16.mxu1 %v1843_v26  ;;  %1654 = vmatpush1.bf16.msra.mxu0 %v1653_v34  ;;  %v285_v26 = vld [vmem:[#allocation2 + $0x610] sm:$0xff]  ;;  %v298_v34 = vld [vmem:[#allocation2 + $0x678] sm:$0xff] }
  0xb2   :  { %1656 = vmatprep.subr.bf16.mxu0 %v1655_v36  ;;  %v1865_v36 = vpack.c.bf16 %v289_v28, %v285_v26  ;;  %v1867_v42 = vpack.c.bf16 %v298_v34, %v294_v32  ;;  %v335_v26 = vld [vmem:[#allocation2 + $0x7a0] sm:$0xff]  ;;  %v344_v32 = vld [vmem:[#allocation2 + $0x7e8] sm:$0xff]  ;;  %v334_v34 = vld [vmem:[#allocation2 + $0x798] sm:$0xff] }
  0xb4   :  { %1846 = vmatpush1.bf16.msra.mxu1 %v1845_v35  ;;  %v1673_v35 = vpack.c.bf16 %v295_v25, %v291_v24  ;;  %v1691_v24 = vpack.c.bf16 %v336_v19, %v332_v17  ;;  %v331_v25 = vld [vmem:[#allocation2 + $0x780] sm:$0xff]  ;;  %v361_v19 = vld [vmem:[#allocation2 + $0x870] sm:$0xff] }
  0xb5   :  { %1848 = vmatprep.subr.bf16.mxu1 %v1847_v41  ;;  %1658 = vmatpush1.bf16.msra.mxu0 %v1657_v48  ;;  %v293_v41 = vld [vmem:[#allocation2 + $0x650] sm:$0xff]  ;;  %v306_v48 = vld [vmem:[#allocation2 + $0x6b8] sm:$0xff] }
  0xb6   :  { %1660 = vmatprep.subr.bf16.mxu0 %v1659_v50  ;;  %v1869_v50 = vpack.c.bf16 %v297_v43, %v293_v41  ;;  %v1871_v55 = vpack.c.bf16 %v306_v48, %v302_v47  ;;  %v343_v41 = vld [vmem:[#allocation2 + $0x7e0] sm:$0xff]  ;;  %v352_v47 = vld [vmem:[#allocation2 + $0x828] sm:$0xff]  ;;  %v342_v48 = vld [vmem:[#allocation2 + $0x7d8] sm:$0xff] }
  0xb8   :  { %1850 = vmatpush1.bf16.msra.mxu1 %v1849_v49  ;;  %v1677_v49 = vpack.c.bf16 %v303_v39, %v299_v38  ;;  %v1695_v38 = vpack.c.bf16 %v344_v32, %v340_v30  ;;  %v339_v39 = vld [vmem:[#allocation2 + $0x7c0] sm:$0xff]  ;;  %v369_v32 = vld [vmem:[#allocation2 + $0x8b0] sm:$0xff] }
  0xb9   :  { %1852 = vmatprep.subr.bf16.mxu1 %v1851_v54  ;;  %1662 = vmatpush1.bf16.msra.mxu0 %v1661_v58  ;;  %v301_v54 = vld [vmem:[#allocation2 + $0x690] sm:$0xff]  ;;  %v314_v58 = vld [vmem:[#allocation2 + $0x6f8] sm:$0xff] }
  0xba   :  { %1664 = vmatprep.subr.bf16.mxu0 %v1663_v60  ;;  %v1873_v60 = vpack.c.bf16 %v305_v56, %v301_v54  ;;  %v1875_v2 = vpack.c.bf16 %v314_v58, %v310_v57  ;;  %v351_v54 = vld [vmem:[#allocation2 + $0x820] sm:$0xff]  ;;  %v360_v57 = vld [vmem:[#allocation2 + $0x868] sm:$0xff]  ;;  %v350_v58 = vld [vmem:[#allocation2 + $0x818] sm:$0xff] }
  0xbc   :  { %1854 = vmatpush1.bf16.msra.mxu1 %v1853_v59  ;;  %v1681_v59 = vpack.c.bf16 %v311_v53, %v307_v52  ;;  %v1699_v52 = vpack.c.bf16 %v352_v47, %v348_v46  ;;  %v347_v53 = vld [vmem:[#allocation2 + $0x800] sm:$0xff]  ;;  %v377_v46 = vld [vmem:[#allocation2 + $0x8f0] sm:$0xff]  ;;  %v388_v47 = vld [vmem:[#allocation2 + $0x948] sm:$0xff] }
  0xbd   :  { %1856 = vmatprep.subr.bf16.mxu1 %v1855_v1  ;;  %1666 = vmatpush1.bf16.msra.mxu0 %v1665_v8  ;;  %v309_v1 = vld [vmem:[#allocation2 + $0x6d0] sm:$0xff]  ;;  %v322_v8 = vld [vmem:[#allocation2 + $0x738] sm:$0xff] }
  0xbe   :  { %1668 = vmatprep.subr.bf16.mxu0 %v1667_v10  ;;  %v1877_v10 = vpack.c.bf16 %v313_v3, %v309_v1  ;;  %v1879_v15 = vpack.c.bf16 %v322_v8, %v318_v7  ;;  %v355_v1 = vld [vmem:[#allocation2 + $0x840] sm:$0xff]  ;;  %v349_v3 = vld [vmem:[#allocation2 + $0x810] sm:$0xff]  ;;  %v364_v7 = vld [vmem:[#allocation2 + $0x888] sm:$0xff] }
  0xbf   :  { %v368_v8 = vld [vmem:[#allocation2 + $0x8a8] sm:$0xff] }
  0xc0   :  { %1858 = vmatpush1.bf16.msra.mxu1 %v1857_v9  ;;  %v1685_v9 = vpack.c.bf16 %v319_v63, %v315_v62  ;;  %v1703_v63 = vpack.c.bf16 %v360_v57, %v356_v21  ;;  %v385_v21 = vld [vmem:[#allocation2 + $0x930] sm:$0xff]  ;;  %v396_v57 = vld [vmem:[#allocation2 + $0x988] sm:$0xff] }
  0xc1   :  { %1860 = vmatprep.subr.bf16.mxu1 %v1859_v14  ;;  %1670 = vmatpush1.bf16.msra.mxu0 %v1669_v40  ;;  %v317_v14 = vld [vmem:[#allocation2 + $0x710] sm:$0xff]  ;;  %v330_v40 = vld [vmem:[#allocation2 + $0x778] sm:$0xff] }
  0xc2   :  { %1672 = vmatprep.subr.bf16.mxu0 %v1671_v23  ;;  %v1881_v23 = vpack.c.bf16 %v321_v16, %v317_v14  ;;  %v1883_v28 = vpack.c.bf16 %v330_v40, %v326_v20  ;;  %v363_v14 = vld [vmem:[#allocation2 + $0x880] sm:$0xff]  ;;  %v357_v16 = vld [vmem:[#allocation2 + $0x850] sm:$0xff]  ;;  %v372_v20 = vld [vmem:[#allocation2 + $0x8c8] sm:$0xff] }
  0xc3   :  { %v376_v40 = vld [vmem:[#allocation2 + $0x8e8] sm:$0xff] }
  0xc4   :  { %1862 = vmatpush1.bf16.msra.mxu1 %v1861_v22  ;;  %v1689_v22 = vpack.c.bf16 %v327_v13, %v323_v12  ;;  %v1897_v12 = vpack.c.bf16 %v353_v6, %v349_v3  ;;  %v1707_v13 = vpack.c.bf16 %v368_v8, %v364_v7  ;;  %v389_v3 = vld [vmem:[#allocation2 + $0x950] sm:$0xff]  ;;  %v404_v7 = vld [vmem:[#allocation2 + $0x9c8] sm:$0xff] }
  0xc5   :  { %1864 = vmatprep.subr.bf16.mxu1 %v1863_v27  ;;  %1674 = vmatpush1.bf16.msra.mxu0 %v1673_v35  ;;  %v325_v27 = vld [vmem:[#allocation2 + $0x750] sm:$0xff]  ;;  %v338_v35 = vld [vmem:[#allocation2 + $0x7b8] sm:$0xff]  ;;  %v408_v8 = vld [vmem:[#allocation2 + $0x9e8] sm:$0xff] }
  0xc6   :  { %1676 = vmatprep.subr.bf16.mxu0 %v1675_v37  ;;  %v1885_v37 = vpack.c.bf16 %v329_v29, %v325_v27  ;;  %v1887_v43 = vpack.c.bf16 %v338_v35, %v334_v34  ;;  %v371_v27 = vld [vmem:[#allocation2 + $0x8c0] sm:$0xff]  ;;  %v365_v29 = vld [vmem:[#allocation2 + $0x890] sm:$0xff]  ;;  %v380_v34 = vld [vmem:[#allocation2 + $0x908] sm:$0xff] }
  0xc7   :  { %v384_v35 = vld [vmem:[#allocation2 + $0x928] sm:$0xff]  ;;  %v393_v6 = vld [vmem:[#allocation2 + $0x970] sm:$0xff] }
  0xc8   :  { %1866 = vmatpush1.bf16.msra.mxu1 %v1865_v36  ;;  %v1693_v36 = vpack.c.bf16 %v335_v26, %v331_v25  ;;  %v1901_v25 = vpack.c.bf16 %v361_v19, %v357_v16  ;;  %v1711_v26 = vpack.c.bf16 %v376_v40, %v372_v20  ;;  %v397_v16 = vld [vmem:[#allocation2 + $0x990] sm:$0xff]  ;;  %v412_v20 = vld [vmem:[#allocation2 + $0xa08] sm:$0xff] }
  0xc9   :  { %1868 = vmatprep.subr.bf16.mxu1 %v1867_v42  ;;  %1678 = vmatpush1.bf16.msra.mxu0 %v1677_v49  ;;  %v333_v42 = vld [vmem:[#allocation2 + $0x790] sm:$0xff]  ;;  %v346_v49 = vld [vmem:[#allocation2 + $0x7f8] sm:$0xff]  ;;  %v416_v40 = vld [vmem:[#allocation2 + $0xa28] sm:$0xff] }
  0xca   :  { %1680 = vmatprep.subr.bf16.mxu0 %v1679_v51  ;;  %v1889_v51 = vpack.c.bf16 %v337_v44, %v333_v42  ;;  %v1891_v56 = vpack.c.bf16 %v346_v49, %v342_v48  ;;  %v383_v42 = vld [vmem:[#allocation2 + $0x920] sm:$0xff]  ;;  %v392_v48 = vld [vmem:[#allocation2 + $0x968] sm:$0xff]  ;;  %v382_v49 = vld [vmem:[#allocation2 + $0x918] sm:$0xff] }
  0xcb   :  { %v401_v19 = vld [vmem:[#allocation2 + $0x9b0] sm:$0xff] }
  0xcc   :  { %1870 = vmatpush1.bf16.msra.mxu1 %v1869_v50  ;;  %v1697_v50 = vpack.c.bf16 %v343_v41, %v339_v39  ;;  %v1715_v39 = vpack.c.bf16 %v384_v35, %v380_v34  ;;  %v379_v41 = vld [vmem:[#allocation2 + $0x900] sm:$0xff]  ;;  %v420_v34 = vld [vmem:[#allocation2 + $0xa48] sm:$0xff] }
  0xcd   :  { %1872 = vmatprep.subr.bf16.mxu1 %v1871_v55  ;;  %1682 = vmatpush1.bf16.msra.mxu0 %v1681_v59  ;;  %v341_v55 = vld [vmem:[#allocation2 + $0x7d0] sm:$0xff]  ;;  %v354_v59 = vld [vmem:[#allocation2 + $0x838] sm:$0xff]  ;;  %v424_v35 = vld [vmem:[#allocation2 + $0xa68] sm:$0xff] }
  0xce   :  { %1684 = vmatprep.subr.bf16.mxu0 %v1683_v61  ;;  %v539_v61 = vcombine.high %v2373_v45, %v2373_v45  ;;  %v1893_v62 = vpack.c.bf16 %v345_v18, %v341_v55  ;;  %v1895_v5 = vpack.c.bf16 %v354_v59, %v350_v58  ;;  %v391_v55 = vld [vmem:[#allocation2 + $0x960] sm:$0xff]  ;;  %v400_v58 = vld [vmem:[#allocation2 + $0x9a8] sm:$0xff]  ;;  %v390_v59 = vld [vmem:[#allocation2 + $0x958] sm:$0xff] }
  0xd0   :  { %1874 = vmatpush1.bf16.msra.mxu1 %v1873_v60  ;;  %v1701_v60 = vpack.c.bf16 %v351_v54, %v347_v53  ;;  %v1719_v53 = vpack.c.bf16 %v392_v48, %v388_v47  ;;  %v387_v54 = vld [vmem:[#allocation2 + $0x940] sm:$0xff]  ;;  %v428_v47 = vld [vmem:[#allocation2 + $0xa88] sm:$0xff] }
  0xd1   :  { %1876 = vmatprep.subr.bf16.mxu1 %v1875_v2  ;;  %1686 = vmatpush1.bf16.msra.mxu0 %v1685_v9  ;;  %v359_v2 = vld [vmem:[#allocation2 + $0x860] sm:$0xff]  ;;  %v358_v9 = vld [vmem:[#allocation2 + $0x858] sm:$0xff]  ;;  %v432_v48 = vld [vmem:[#allocation2 + $0xaa8] sm:$0xff] }
  0xd2   :  { %1688 = vmatprep.subr.bf16.mxu0 %v1687_v11  ;;  %v1705_v11 = vpack.c.bf16 %v359_v2, %v355_v1  ;;  %v395_v1 = vld [vmem:[#allocation2 + $0x980] sm:$0xff] }
  0xd3   :  { %v399_v2 = vld [vmem:[#allocation2 + $0x9a0] sm:$0xff] }
  0xd4   :  { %1878 = vmatpush1.bf16.msra.mxu1 %v1877_v10  ;;  %v362_v10 = vld [vmem:[#allocation2 + $0x878] sm:$0xff] }
  0xd5   :  { %1880 = vmatprep.subr.bf16.mxu1 %v1879_v15  ;;  %1690 = vmatpush1.bf16.msra.mxu0 %v1689_v22  ;;  %v367_v15 = vld [vmem:[#allocation2 + $0x8a0] sm:$0xff]  ;;  %v1899_v17 = vpack.c.bf16 %v362_v10, %v358_v9  ;;  %v366_v22 = vld [vmem:[#allocation2 + $0x898] sm:$0xff] }
  0xd6   :  { %1692 = vmatprep.subr.bf16.mxu0 %v1691_v24  ;;  %v1709_v24 = vpack.c.bf16 %v367_v15, %v363_v14  ;;  %v398_v9 = vld [vmem:[#allocation2 + $0x998] sm:$0xff]  ;;  %v403_v14 = vld [vmem:[#allocation2 + $0x9c0] sm:$0xff] }
  0xd7   :  { %v402_v10 = vld [vmem:[#allocation2 + $0x9b8] sm:$0xff]  ;;  %v407_v15 = vld [vmem:[#allocation2 + $0x9e0] sm:$0xff] }
  0xd8   :  { %1882 = vmatpush1.bf16.msra.mxu1 %v1881_v23  ;;  %v370_v23 = vld [vmem:[#allocation2 + $0x8b8] sm:$0xff] }
  0xd9   :  { %1884 = vmatprep.subr.bf16.mxu1 %v1883_v28  ;;  %1694 = vmatpush1.bf16.msra.mxu0 %v1693_v36  ;;  %v375_v28 = vld [vmem:[#allocation2 + $0x8e0] sm:$0xff]  ;;  %v1903_v30 = vpack.c.bf16 %v370_v23, %v366_v22  ;;  %v374_v36 = vld [vmem:[#allocation2 + $0x8d8] sm:$0xff] }
  0xda   :  { %1696 = vmatprep.subr.bf16.mxu0 %v1695_v38  ;;  %v1713_v38 = vpack.c.bf16 %v375_v28, %v371_v27  ;;  %v406_v22 = vld [vmem:[#allocation2 + $0x9d8] sm:$0xff]  ;;  %v411_v27 = vld [vmem:[#allocation2 + $0xa00] sm:$0xff] }
  0xdb   :  { %v410_v23 = vld [vmem:[#allocation2 + $0x9f8] sm:$0xff]  ;;  %v415_v28 = vld [vmem:[#allocation2 + $0xa20] sm:$0xff] }
  0xdc   :  { %1886 = vmatpush1.bf16.msra.mxu1 %v1885_v37  ;;  %v378_v37 = vld [vmem:[#allocation2 + $0x8f8] sm:$0xff] }
  0xdd   :  { %1888 = vmatprep.subr.bf16.mxu1 %v1887_v43  ;;  %1698 = vmatpush1.bf16.msra.mxu0 %v1697_v50  ;;  %v373_v43 = vld [vmem:[#allocation2 + $0x8d0] sm:$0xff]  ;;  %v1907_v44 = vpack.c.bf16 %v378_v37, %v374_v36  ;;  %v386_v50 = vld [vmem:[#allocation2 + $0x938] sm:$0xff] }
  0xde   :  { %1700 = vmatprep.subr.bf16.mxu0 %v1699_v52  ;;  %v1909_v52 = vpack.c.bf16 %v377_v46, %v373_v43  ;;  %v1911_v18 = vpack.c.bf16 %v386_v50, %v382_v49  ;;  %v414_v36 = vld [vmem:[#allocation2 + $0xa18] sm:$0xff]  ;;  %v413_v43 = vld [vmem:[#allocation2 + $0xa10] sm:$0xff] }
  0xdf   :  { %v418_v37 = vld [vmem:[#allocation2 + $0xa38] sm:$0xff]  ;;  %v417_v46 = vld [vmem:[#allocation2 + $0xa30] sm:$0xff] }
  0xe0   :  { %1890 = vmatpush1.bf16.msra.mxu1 %v1889_v51  ;;  %685 = vmatmul.mubr.f32.vlgmr.msra.gmra.mrb[0].mxu0 %v2369_v31  ;;  %v1717_v51 = vpack.c.bf16 %v383_v42, %v379_v41  ;;  %v419_v41 = vld [vmem:[#allocation2 + $0xa40] sm:$0xff]  ;;  %v422_v49 = vld [vmem:[#allocation2 + $0xa58] sm:$0xff] }
  0xe1   :  { %1892 = vmatprep.subr.bf16.mxu1 %v1891_v56  ;;  %1702 = vmatpush1.bf16.msra.mxu0 %v1701_v60  ;;  %v381_v56 = vld [vmem:[#allocation2 + $0x910] sm:$0xff]  ;;  %v394_v60 = vld [vmem:[#allocation2 + $0x978] sm:$0xff]  ;;  %v423_v42 = vld [vmem:[#allocation2 + $0xa60] sm:$0xff] }
  0xe2   :  { %755 = vmatprep.mubr.f32.mxu0 %v539_v61  ;;  %1704 = vmatprep.subr.bf16.mxu0 %v1703_v63  ;;  %v1723_v63 = vpack.c.bf16 %v400_v58, %v396_v57  ;;  %v426_v50 = vld [vmem:[#allocation2 + $0xa78] sm:$0xff]  ;;  %v436_v57 = vld [vmem:[#allocation2 + $0xac8] sm:$0xff] }
  0xe3   :  { %v440_v58 = vld [vmem:[#allocation2 + $0xae8] sm:$0xff] }
  0xe4   :  { %1894 = vmatpush1.bf16.msra.mxu1 %v1893_v62  ;;  %v1913_v62 = vpack.c.bf16 %v385_v21, %v381_v56  ;;  %v421_v56 = vld [vmem:[#allocation2 + $0xa50] sm:$0xff] }
  0xe5   :  { %1896 = vmatprep.subr.bf16.mxu1 %v1895_v5  ;;  %1706 = vmatpush1.bf16.msra.mxu0 %v1705_v11  ;;  %v1915_v5 = vpack.c.bf16 %v394_v60, %v390_v59  ;;  %v1725_v11 = vpack.c.bf16 %v399_v2, %v395_v1  ;;  %v425_v21 = vld [vmem:[#allocation2 + $0xa70] sm:$0xff]  ;;  %v430_v59 = vld [vmem:[#allocation2 + $0xa98] sm:$0xff]  ;;  %v435_v1 = vld [vmem:[#allocation2 + $0xac0] sm:$0xff] }
  0xe6   :  { %1708 = vmatprep.subr.bf16.mxu0 %v1707_v13  ;;  %v1727_v13 = vpack.c.bf16 %v408_v8, %v404_v7  ;;  %v434_v60 = vld [vmem:[#allocation2 + $0xab8] sm:$0xff]  ;;  %v439_v2 = vld [vmem:[#allocation2 + $0xae0] sm:$0xff]  ;;  %v444_v7 = vld [vmem:[#allocation2 + $0xb08] sm:$0xff] }
  0xe7   :  { %969 = vmatmul.mubr.f32.vlgmr.msra.gmra.mrb[2].mxu1 %v2369_v31  ;;  %v1905_v31 = vpack.c.bf16 %v369_v32, %v365_v29  ;;  %v405_v29 = vld [vmem:[#allocation2 + $0x9d0] sm:$0xff]  ;;  %v448_v8 = vld [vmem:[#allocation2 + $0xb28] sm:$0xff] }
  0xe8   :  { %1898 = vmatpush1.bf16.msra.mxu1 %v1897_v12  ;;  %1039 = vmatprep.mubr.f32.mxu1 %v539_v61  ;;  %v1721_v61 = vpack.c.bf16 %v391_v55, %v387_v54  ;;  %v1917_v12 = vpack.c.bf16 %v393_v6, %v389_v3  ;;  %v409_v32 = vld [vmem:[#allocation2 + $0x9f0] sm:$0xff]  ;;  %v427_v54 = vld [vmem:[#allocation2 + $0xa80] sm:$0xff] }
  0xe9   :  { %1900 = vmatprep.subr.bf16.mxu1 %v1899_v17  ;;  %1710 = vmatpush1.bf16.msra.mxu0 %v1709_v24  ;;  %v1919_v17 = vpack.c.bf16 %v402_v10, %v398_v9  ;;  %v1729_v24 = vpack.c.bf16 %v407_v15, %v403_v14  ;;  %v431_v55 = vld [vmem:[#allocation2 + $0xaa0] sm:$0xff]  ;;  %v429_v3 = vld [vmem:[#allocation2 + $0xa90] sm:$0xff]  ;;  %v438_v9 = vld [vmem:[#allocation2 + $0xad8] sm:$0xff] }
  0xea   :  { %1712 = vmatprep.subr.bf16.mxu0 %v1711_v26  ;;  %v1731_v26 = vpack.c.bf16 %v416_v40, %v412_v20  ;;  %v433_v6 = vld [vmem:[#allocation2 + $0xab0] sm:$0xff]  ;;  %v442_v10 = vld [vmem:[#allocation2 + $0xaf8] sm:$0xff]  ;;  %v443_v14 = vld [vmem:[#allocation2 + $0xb00] sm:$0xff] }
  0xeb   :  { %v447_v15 = vld [vmem:[#allocation2 + $0xb20] sm:$0xff]  ;;  %v452_v20 = vld [vmem:[#allocation2 + $0xb48] sm:$0xff] }
  0xec   :  { %1902 = vmatpush1.bf16.msra.mxu1 %v1901_v25  ;;  %v1921_v25 = vpack.c.bf16 %v401_v19, %v397_v16  ;;  %v437_v16 = vld [vmem:[#allocation2 + $0xad0] sm:$0xff]  ;;  %v456_v40 = vld [vmem:[#allocation2 + $0xb68] sm:$0xff] }
  0xed   :  { %1904 = vmatprep.subr.bf16.mxu1 %v1903_v30  ;;  %1714 = vmatpush1.bf16.msra.mxu0 %v1713_v38  ;;  %v1923_v30 = vpack.c.bf16 %v410_v23, %v406_v22  ;;  %v1733_v38 = vpack.c.bf16 %v415_v28, %v411_v27  ;;  %v441_v19 = vld [vmem:[#allocation2 + $0xaf0] sm:$0xff]  ;;  %v446_v22 = vld [vmem:[#allocation2 + $0xb18] sm:$0xff]  ;;  %v451_v27 = vld [vmem:[#allocation2 + $0xb40] sm:$0xff] }
  0xee   :  { %1716 = vmatprep.subr.bf16.mxu0 %v1715_v39  ;;  %v1735_v39 = vpack.c.bf16 %v424_v35, %v420_v34  ;;  %v450_v23 = vld [vmem:[#allocation2 + $0xb38] sm:$0xff]  ;;  %v455_v28 = vld [vmem:[#allocation2 + $0xb60] sm:$0xff]  ;;  %v460_v34 = vld [vmem:[#allocation2 + $0xb88] sm:$0xff] }
  0xef   :  { %v464_v35 = vld [vmem:[#allocation2 + $0xba8] sm:$0xff] }
  0xf0   :  { %1906 = vmatpush1.bf16.msra.mxu1 %v1905_v31  ;;  %v1925_v31 = vpack.c.bf16 %v409_v32, %v405_v29  ;;  %v445_v29 = vld [vmem:[#allocation2 + $0xb10] sm:$0xff] }
  0xf1   :  { %1908 = vmatprep.subr.bf16.mxu1 %v1907_v44  ;;  %1718 = vmatpush1.bf16.msra.mxu0 %v1717_v51  ;;  %v1927_v44 = vpack.c.bf16 %v418_v37, %v414_v36  ;;  %v1737_v51 = vpack.c.bf16 %v423_v42, %v419_v41  ;;  %v449_v32 = vld [vmem:[#allocation2 + $0xb30] sm:$0xff]  ;;  %v454_v36 = vld [vmem:[#allocation2 + $0xb58] sm:$0xff]  ;;  %v459_v41 = vld [vmem:[#allocation2 + $0xb80] sm:$0xff] }
  0xf2   :  { %1720 = vmatprep.subr.bf16.mxu0 %v1719_v53  ;;  %v1739_v53 = vpack.c.bf16 %v432_v48, %v428_v47  ;;  %v458_v37 = vld [vmem:[#allocation2 + $0xb78] sm:$0xff]  ;;  %v463_v42 = vld [vmem:[#allocation2 + $0xba0] sm:$0xff]  ;;  %v468_v47 = vld [vmem:[#allocation2 + $0xbc8] sm:$0xff] }
  0xf3   :  { %v472_v48 = vld [vmem:[#allocation2 + $0xbe8] sm:$0xff] }
  0xf4   :  { %1910 = vmatpush1.bf16.msra.mxu1 %v1909_v52  ;;  %v1929_v52 = vpack.c.bf16 %v417_v46, %v413_v43  ;;  %v453_v43 = vld [vmem:[#allocation2 + $0xb50] sm:$0xff] }
  0xf5   :  { %1912 = vmatprep.subr.bf16.mxu1 %v1911_v18  ;;  %1722 = vmatpush1.bf16.msra.mxu0 %v1721_v61  ;;  %v1931_v18 = vpack.c.bf16 %v426_v50, %v422_v49  ;;  %v1741_v61 = vpack.c.bf16 %v431_v55, %v427_v54  ;;  %v457_v46 = vld [vmem:[#allocation2 + $0xb70] sm:$0xff]  ;;  %v462_v49 = vld [vmem:[#allocation2 + $0xb98] sm:$0xff]  ;;  %v467_v54 = vld [vmem:[#allocation2 + $0xbc0] sm:$0xff] }
  0xf6   :  { %1724 = vmatprep.subr.bf16.mxu0 %v1723_v63  ;;  %v1743_v63 = vpack.c.bf16 %v440_v58, %v436_v57  ;;  %v466_v50 = vld [vmem:[#allocation2 + $0xbb8] sm:$0xff]  ;;  %v471_v55 = vld [vmem:[#allocation2 + $0xbe0] sm:$0xff]  ;;  %v1138_v58 = vld [vmem:[#allocation7 + $0x88] sm:$0xff] }
  0xf7   :  { %v1137_v57 = vld [vmem:[#allocation7 + $0x80] sm:$0xff] }
  0xf8   :  { %1914 = vmatpush1.bf16.msra.mxu1 %v1913_v62  ;;  %v1933_v62 = vpack.c.bf16 %v425_v21, %v421_v56  ;;  %v461_v56 = vld [vmem:[#allocation2 + $0xb90] sm:$0xff] }
  0xf9   :  { %1916 = vmatprep.subr.bf16.mxu1 %v1915_v5  ;;  %1726 = vmatpush1.bf16.msra.mxu0 %v1725_v11  ;;  %v1935_v5 = vpack.c.bf16 %v434_v60, %v430_v59  ;;  %v1745_v11 = vpack.c.bf16 %v439_v2, %v435_v1  ;;  %v465_v21 = vld [vmem:[#allocation2 + $0xbb0] sm:$0xff]  ;;  %v470_v59 = vld [vmem:[#allocation2 + $0xbd8] sm:$0xff]  ;;  %v1963_v1 = vpack.c.bf16 %v1138_v58, %v1137_v57  ;;  %v1121_v2 = vld [vmem:[#allocation7] sm:$0xff] }
  0xfa   :  { %1728 = vmatprep.subr.bf16.mxu0 %v1727_v13  ;;  %v1747_v13 = vpack.c.bf16 %v448_v8, %v444_v7  ;;  %v474_v60 = vld [vmem:[#allocation2 + $0xbf8] sm:$0xff] }
  0xfb   :  { %v1139_v7 = vld [vmem:[#allocation7 + $0x90] sm:$0xff]  ;;  %v1140_v8 = vld [vmem:[#allocation7 + $0x98] sm:$0xff] }
  0xfc   :  { %1918 = vmatpush1.bf16.msra.mxu1 %v1917_v12  ;;  %v1937_v12 = vpack.c.bf16 %v433_v6, %v429_v3  ;;  %v1122_v3 = vld [vmem:[#allocation7 + $0x8] sm:$0xff]  ;;  %v1131_v57 = vld [vmem:[#allocation7 + $0x50] sm:$0xff]  ;;  %v1132_v58 = vld [vmem:[#allocation7 + $0x58] sm:$0xff] }
  0xfd   :  { %1920 = vmatprep.subr.bf16.mxu1 %v1919_v17  ;;  %1730 = vmatpush1.bf16.msra.mxu0 %v1729_v24  ;;  %v1939_v17 = vpack.c.bf16 %v442_v10, %v438_v9  ;;  %v1749_v24 = vpack.c.bf16 %v447_v15, %v443_v14  ;;  %v473_v6 = vld [vmem:[#allocation2 + $0xbf0] sm:$0xff]  ;;  %v478_v9 = vld [vmem:[#allocation2 + $0xc18] sm:$0xff] }
  0xfe   :  { %1732 = vmatprep.subr.bf16.mxu0 %v1731_v26  ;;  %v1751_v26 = vpack.c.bf16 %v456_v40, %v452_v20  ;;  %v482_v10 = vld [vmem:[#allocation2 + $0xc38] sm:$0xff]  ;;  %v1141_v20 = vld [vmem:[#allocation7 + $0xa0] sm:$0xff]  ;;  %v1142_v40 = vld [vmem:[#allocation7 + $0xa8] sm:$0xff] }
  0xff   :  { %v1123_v14 = vld [vmem:[#allocation7 + $0x10] sm:$0xff]  ;;  %v1124_v15 = vld [vmem:[#allocation7 + $0x18] sm:$0xff] }
 0x100   :  { %1922 = vmatpush1.bf16.msra.mxu1 %v1921_v25  ;;  %v1941_v25 = vpack.c.bf16 %v441_v19, %v437_v16  ;;  %v1959_v16 = vpack.c.bf16 %v482_v10, %v478_v9  ;;  %v481_v19 = vld [vmem:[#allocation2 + $0xc30] sm:$0xff]  ;;  %v1149_v9 = vld [vmem:[#allocation7 + $0xe0] sm:$0xff] }
 0x101   :  { %1924 = vmatprep.subr.bf16.mxu1 %v1923_v30  ;;  %1734 = vmatpush1.bf16.msra.mxu0 %v1733_v38  ;;  %v1943_v30 = vpack.c.bf16 %v450_v23, %v446_v22  ;;  %v1753_v38 = vpack.c.bf16 %v455_v28, %v451_v27  ;;  %v1169_v22 = vld [vmem:[#allocation7 + $0x180] sm:$0xff]  ;;  %v1170_v23 = vld [vmem:[#allocation7 + $0x188] sm:$0xff]  ;;  %v1971_v28 = vpack.c.bf16 %v1142_v40, %v1141_v20 }
 0x102   :  { %1736 = vmatprep.subr.bf16.mxu0 %v1735_v39  ;;  %v1755_v39 = vpack.c.bf16 %v464_v35, %v460_v34  ;;  %v1126_v27 = vld [vmem:[#allocation7 + $0x28] sm:$0xff]  ;;  %v1153_v35 = vld [vmem:[#allocation7 + $0x100] sm:$0xff] }
 0x103   :  { %v1150_v10 = vld [vmem:[#allocation7 + $0xe8] sm:$0xff] }
 0x104   :  { %1926 = vmatpush1.bf16.msra.mxu1 %v1925_v31  ;;  %v1945_v31 = vpack.c.bf16 %v449_v32, %v445_v29  ;;  %v1995_v29 = vpack.c.bf16 %v1170_v23, %v1169_v22  ;;  %v1144_v32 = vld [vmem:[#allocation7 + $0xb8] sm:$0xff]  ;;  %v1162_v20 = vld [vmem:[#allocation7 + $0x148] sm:$0xff]  ;;  %v1151_v22 = vld [vmem:[#allocation7 + $0xf0] sm:$0xff] }
 0x105   :  { %1928 = vmatprep.subr.bf16.mxu1 %v1927_v44  ;;  %1738 = vmatpush1.bf16.msra.mxu0 %v1737_v51  ;;  %v1947_v44 = vpack.c.bf16 %v458_v37, %v454_v36  ;;  %v1757_v51 = vpack.c.bf16 %v463_v42, %v459_v41  ;;  %v1127_v37 = vld [vmem:[#allocation7 + $0x30] sm:$0xff]  ;;  %v1146_v41 = vld [vmem:[#allocation7 + $0xc8] sm:$0xff]  ;;  %v1152_v23 = vld [vmem:[#allocation7 + $0xf8] sm:$0xff] }
 0x106   :  { %1740 = vmatprep.subr.bf16.mxu0 %v1739_v53  ;;  %v1759_v53 = vpack.c.bf16 %v472_v48, %v468_v47  ;;  %v1171_v42 = vld [vmem:[#allocation7 + $0x190] sm:$0xff]  ;;  %v1129_v48 = vld [vmem:[#allocation7 + $0x40] sm:$0xff] }
 0x108   :  { %1930 = vmatpush1.bf16.msra.mxu1 %v1929_v52  ;;  %v1949_v52 = vpack.c.bf16 %v457_v46, %v453_v43  ;;  %v1172_v43 = vld [vmem:[#allocation7 + $0x198] sm:$0xff] }
 0x109   :  { %1932 = vmatprep.subr.bf16.mxu1 %v1931_v18  ;;  %1742 = vmatpush1.bf16.msra.mxu0 %v1741_v61  ;;  %v1951_v18 = vpack.c.bf16 %v466_v50, %v462_v49  ;;  %v1761_v61 = vpack.c.bf16 %v471_v55, %v467_v54  ;;  %v1130_v49 = vld [vmem:[#allocation7 + $0x48] sm:$0xff]  ;;  %v1999_v50 = vpack.c.bf16 %v1172_v43, %v1171_v42  ;;  %v1173_v54 = vld [vmem:[#allocation7 + $0x1a0] sm:$0xff]  ;;  %v1183_v42 = vld [vmem:[#allocation7 + $0x1f0] sm:$0xff] }
 0x10a   :  { %1744 = vmatprep.subr.bf16.mxu0 %v1743_v63  ;;  %v469_v63 = vld [vmem:[#allocation2 + $0xbd0] sm:$0xff]  ;;  %v1184_v43 = vld [vmem:[#allocation7 + $0x1f8] sm:$0xff] }
 0x10b   :  { %v1174_v55 = vld [vmem:[#allocation7 + $0x1a8] sm:$0xff] }
 0x10c   :  { %1934 = vmatpush1.bf16.msra.mxu1 %v1933_v62  ;;  %v1953_v62 = vpack.c.bf16 %v465_v21, %v461_v56  ;;  %v1981_v56 = vpack.c.bf16 %v1130_v49, %v1129_v48  ;;  %v2234_v48 = vmov 0.0|0.0   ;;  %v487_v49 = vsub.s32 0, %v2338_v4 }
 0x10d   :  { %1936 = vmatprep.subr.bf16.mxu1 %v1935_v5  ;;  %1746 = vmatpush1.bf16.msra.mxu0 %v1745_v11  ;;  %v1955_v5 = vpack.c.bf16 %v474_v60, %v470_v59  ;;  %v1965_v11 = vpack.c.bf16 %v1122_v3, %v1121_v2  ;;  %v2003_v59 = vpack.c.bf16 %v1174_v55, %v1173_v54  ;;  %v1157_v60 = vld [vmem:[#allocation7 + $0x120] sm:$0xff] }
 0x10e   :  { %1748 = vmatprep.subr.bf16.mxu0 %v1747_v13  ;;  %v1967_v13 = vpack.c.bf16 %v1140_v8, %v1139_v7  ;;  %v1160_v7 = vld [vmem:[#allocation7 + $0x138] sm:$0xff] }
 0x110   :  { %1938 = vmatpush1.bf16.msra.mxu1 %v1937_v12  ;;  %v1957_v12 = vpack.c.bf16 %v473_v6, %v469_v63  ;;  %v1176_v63 = vld [vmem:[#allocation7 + $0x1b8] sm:$0xff]  ;;  %v1159_v6 = vld [vmem:[#allocation7 + $0x130] sm:$0xff] }
 0x111   :  { %1940 = vmatprep.subr.bf16.mxu1 %v1939_v17  ;;  %1750 = vmatpush1.bf16.msra.mxu0 %v1749_v24  ;;  %v477_v17 = vld [vmem:[#allocation2 + $0xc10] sm:$0xff]  ;;  %v1969_v24 = vpack.c.bf16 %v1124_v15, %v1123_v14  ;;  %v2009_v8 = vpack.c.bf16 %v1160_v7, %v1159_v6  ;;  %v1177_v15 = vld [vmem:[#allocation7 + $0x1c0] sm:$0xff] }
 0x112   :  { %1752 = vmatprep.subr.bf16.mxu0 %v1751_v26  ;;  %v1125_v26 = vld [vmem:[#allocation7 + $0x20] sm:$0xff] }
 0x113   :  { %v1973_v34 = vpack.c.bf16 %v1126_v27, %v1125_v26  ;;  %v1136_v26 = vld [vmem:[#allocation7 + $0x78] sm:$0xff] }
 0x114   :  { %1942 = vmatpush1.bf16.msra.mxu1 %v1941_v25  ;;  %v1961_v25 = vpack.c.bf16 %v481_v19, %v477_v17  ;;  %v1161_v19 = vld [vmem:[#allocation7 + $0x140] sm:$0xff] }
 0x115   :  { %1944 = vmatprep.subr.bf16.mxu1 %v1943_v30  ;;  %1754 = vmatpush1.bf16.msra.mxu0 %v1753_v38  ;;  %v1143_v30 = vld [vmem:[#allocation7 + $0xb0] sm:$0xff]  ;;  %v1128_v38 = vld [vmem:[#allocation7 + $0x38] sm:$0xff]  ;;  %v2013_v40 = vpack.c.bf16 %v1162_v20, %v1161_v19  ;;  %v1342_v20 = vld [vmem:[%s2464_s5 + $0x48] sm:$0xff] }
 0x116   :  { %1756 = vmatprep.subr.bf16.mxu0 %v1755_v39  ;;  %v1975_v36 = vpack.c.bf16 %v1144_v32, %v1143_v30  ;;  %v1145_v39 = vld [vmem:[#allocation7 + $0xc0] sm:$0xff]  ;;  %v1163_v32 = vld [vmem:[#allocation7 + $0x150] sm:$0xff] }
 0x117   :  { %v1979_v47 = vpack.c.bf16 %v1146_v41, %v1145_v39  ;;  %v1166_v39 = vld [vmem:[#allocation7 + $0x168] sm:$0xff]  ;;  %v1337_v7 = vld [vmem:[%s2464_s5 + $0x20] sm:$0xff] }
 0x118   :  { %1946 = vmatpush1.bf16.msra.mxu1 %v1945_v31  ;;  %v1154_v31 = vld [vmem:[#allocation7 + $0x108] sm:$0xff]  ;;  %v1341_v19 = vld [vmem:[%s2464_s5 + $0x40] sm:$0xff] }
 0x119   :  { %1948 = vmatprep.subr.bf16.mxu1 %v1947_v44  ;;  %1758 = vmatpush1.bf16.msra.mxu0 %v1757_v51  ;;  %v1977_v44 = vpack.c.bf16 %v1128_v38, %v1127_v37  ;;  %v1997_v46 = vpack.c.bf16 %v1154_v31, %v1153_v35  ;;  %v1156_v51 = vld [vmem:[#allocation7 + $0x118] sm:$0xff]  ;;  %v1182_v37 = vld [vmem:[#allocation7 + $0x1e8] sm:$0xff]  ;;  %v1165_v31 = vld [vmem:[#allocation7 + $0x160] sm:$0xff] }
 0x11a   :  { %1760 = vmatprep.subr.bf16.mxu0 %v1759_v53  ;;  %v1148_v53 = vld [vmem:[#allocation7 + $0xd8] sm:$0xff]  ;;  %v2021_v41 = vpack.c.bf16 %v1166_v39, %v1165_v31 }
 0x11c   :  { %1950 = vmatpush1.bf16.msra.mxu1 %v1949_v52  ;;  %v1147_v52 = vld [vmem:[#allocation7 + $0xd0] sm:$0xff] }
 0x11d   :  { %1952 = vmatprep.subr.bf16.mxu1 %v1951_v18  ;;  %1762 = vmatpush1.bf16.msra.mxu0 %v1761_v61  ;;  %v1983_v21 = vpack.c.bf16 %v1148_v53, %v1147_v52  ;;  %v1158_v61 = vld [vmem:[#allocation7 + $0x128] sm:$0xff] }
 0x11e   :  { %1964 = vmatprep.subr.bf16.mxu0 %v1963_v1  ;;  %v1985_v1 = vpack.c.bf16 %v1132_v58, %v1131_v57  ;;  %v2005_v2 = vpack.c.bf16 %v1158_v61, %v1157_v60  ;;  %v1333_v57 = vld [vmem:[%s2464_s5] sm:$0xff]  ;;  %v1334_v58 = vld [vmem:[%s2464_s5 + $0x8] sm:$0xff]  ;;  %v495_v61 = vsub.s32 2, %v2338_v4 }
 0x120   :  { %1954 = vmatpush1.bf16.msra.mxu1 %v1953_v62  ;;  %756 = vmatmul.mubr.f32.vlgmr.msra.gmra.mrb[0].mxu0 %v2373_v45  ;;  %v1175_v62 = vld [vmem:[#allocation7 + $0x1b0] sm:$0xff] }
 0x121   :  { %1956 = vmatprep.subr.bf16.mxu1 %v1955_v5  ;;  %1966 = vmatpush3.bf16.msra.mxu0 %v1965_v11  ;;  %v1987_v11 = vpack.c.bf16 %v1150_v10, %v1149_v9 }
 0x122   :  { %1968 = vmatprep.subr.bf16.mxu0 %v1967_v13  ;;  %v1134_v13 = vld [vmem:[#allocation7 + $0x68] sm:$0xff] }
 0x124   :  { %1958 = vmatpush1.bf16.msra.mxu1 %v1957_v12  ;;  %v1133_v12 = vld [vmem:[#allocation7 + $0x60] sm:$0xff] }
 0x125   :  { %1960 = vmatprep.subr.bf16.mxu1 %v1959_v16  ;;  %1970 = vmatpush3.bf16.msra.mxu0 %v1969_v24  ;;  %v1989_v14 = vpack.c.bf16 %v1134_v13, %v1133_v12  ;;  %v1178_v16 = vld [vmem:[#allocation7 + $0x1c8] sm:$0xff]  ;;  %v1991_v24 = vpack.c.bf16 %v1152_v23, %v1151_v22  ;;  %v1344_v23 = vld [vmem:[%s2464_s5 + $0x58] sm:$0xff] }
 0x126   :  { %1972 = vmatprep.subr.bf16.mxu0 %v1971_v28  ;;  %v2011_v17 = vpack.c.bf16 %v1178_v16, %v1177_v15  ;;  %v1179_v28 = vld [vmem:[#allocation7 + $0x1d0] sm:$0xff] }
 0x127   :  { %1040 = vmatmul.mubr.f32.vlgmr.msra.gmra.mrb[2].mxu1 %v2373_v45  ;;  %v1155_v45 = vld [vmem:[#allocation7 + $0x110] sm:$0xff] }
 0x128   :  { %1962 = vmatpush1.bf16.msra.mxu1 %v1961_v25  ;;  %1110 = vmatprep.mubr.f32.mxu1 %v2232_v0  ;;  %v2001_v18 = vpack.c.bf16 %v1156_v51, %v1155_v45  ;;  %v1135_v25 = vld [vmem:[#allocation7 + $0x70] sm:$0xff]  ;;  %v1168_v45 = vld [vmem:[#allocation7 + $0x178] sm:$0xff]  ;;  %v491_v51 = vsub.s32 1, %v2338_v4 }
 0x129   :  { %1996 = vmatprep.subr.bf16.mxu1 %v1995_v29  ;;  %1974 = vmatpush3.bf16.msra.mxu0 %v1973_v34  ;;  %v1993_v27 = vpack.c.bf16 %v1136_v26, %v1135_v25  ;;  %v1180_v29 = vld [vmem:[#allocation7 + $0x1d8] sm:$0xff]  ;;  %v1339_v13 = vld [vmem:[%s2464_s5 + $0x30] sm:$0xff]  ;;  %v1346_v26 = vld [vmem:[%s2464_s5 + $0x68] sm:$0xff] }
 0x12a   :  { %1976 = vmatprep.subr.bf16.mxu0 %v1975_v36  ;;  %v2015_v30 = vpack.c.bf16 %v1180_v29, %v1179_v28  ;;  %v1164_v34 = vld [vmem:[#allocation7 + $0x158] sm:$0xff]  ;;  %v1181_v36 = vld [vmem:[#allocation7 + $0x1e0] sm:$0xff]  ;;  %v1343_v22 = vld [vmem:[%s2464_s5 + $0x50] sm:$0xff] }
 0x12b   :  { %v2017_v35 = vpack.c.bf16 %v1164_v34, %v1163_v32  ;;  %v2019_v38 = vpack.c.bf16 %v1182_v37, %v1181_v36  ;;  %v1345_v25 = vld [vmem:[%s2464_s5 + $0x60] sm:$0xff]  ;;  %v1347_v28 = vld [vmem:[%s2464_s5 + $0x70] sm:$0xff]  ;;  %v1348_v29 = vld [vmem:[%s2464_s5 + $0x78] sm:$0xff] }
 0x12c   :  { %v1447_v36 = vld [vmem:[#allocation8] ss:$0 sm:$0xff] }
 0x12d   :  { %1978 = vmatpush3.bf16.msra.mxu0 %v1977_v44  ;;  %v2023_v44 = vpack.c.bf16 %v1184_v43, %v1183_v42  ;;  %v1448_v43 = vld [vmem:[#allocation10] ss:$0 sm:$0xff] }
 0x12e   :  { %1980 = vmatprep.subr.bf16.mxu0 %v1979_v47 }
 0x12f   :  { %1446 = vmatmul.mubr.msk.f32.vlgmr.msra.gmra.mrb[2].mxu1 %vm546_vm0, %v2351_v33  ;;  %v2007_v33 = vpack.c.bf16 %v1176_v63, %v1175_v62  ;;  %v2028_v62 = vpack.c.bf16 %v1334_v58, %v1333_v57 }
 0x130   :  { %1998 = vmatpush3.bf16.msra.mxu1 %v1997_v46  ;;  %v1167_v46 = vld [vmem:[#allocation7 + $0x170] sm:$0xff] }
 0x131   :  { %2000 = vmatprep.subr.bf16.mxu1 %v1999_v50  ;;  %1982 = vmatpush3.bf16.msra.mxu0 %v1981_v56  ;;  %v2025_v47 = vpack.c.bf16 %v1168_v45, %v1167_v46  ;;  %v483_v50 = vld [vmem:[#allocation5] sm:$0xf] }
 0x132   :  { %1984 = vmatprep.subr.bf16.mxu0 %v1983_v21  ;;  %v488_v52 = vrot.slane %v483_v50, %v487_v49  ;;  %v492_v53 = vrot.slane %v483_v50, %v491_v51 }
 0x134   :  { %2002 = vmatpush3.bf16.msra.mxu1 %v2001_v18 }
 0x135   :  { %2004 = vmatprep.subr.bf16.mxu1 %v2003_v59  ;;  %1986 = vmatpush3.bf16.msra.mxu0 %v1985_v1  ;;  %v499_v1 = vsub.s32 3, %v2338_v4  ;;  %v1338_v4 = vld [vmem:[%s2464_s5 + $0x28] sm:$0xff] }
 0x136   :  { %1988 = vmatprep.subr.bf16.mxu0 %v1987_v11  ;;  %v2034_v11 = vpack.c.bf16 %v1338_v4, %v1337_v7 }
 0x137   :  { %v500_v6 = vrot.slane %v483_v50, %v499_v1 }
 0x138   :  { %2006 = vmatpush3.bf16.msra.mxu1 %v2005_v2  ;;  %v1335_v2 = vld [vmem:[%s2464_s5 + $0x10] sm:$0xff] }
 0x139   :  { %2008 = vmatprep.subr.bf16.mxu1 %v2007_v33  ;;  %1990 = vmatpush3.bf16.msra.mxu0 %v1989_v14  ;;  %v1336_v33 = vld [vmem:[%s2464_s5 + $0x18] sm:$0xff] }
 0x13a   :  { %v2388_v3 = vpop.f32.mrb[0].mxu1  ;;  %1992 = vmatprep.subr.bf16.mxu0 %v1991_v24  ;;  %v1340_v14 = vld [vmem:[%s2464_s5 + $0x38] sm:$0xff]  ;;  %v2043_v24 = vpack.c.bf16 %v1344_v23, %v1343_v22  ;;  %s2193_s5 = scalar_lea.vmem %s1435_s21, 32 }
 0x13b   :  { %v2390_v5 = vpop.f32.mrb[1].mxu1  ;;  %p2194_p12 = scmp.ne.s32.totalorder %s1435_s21, %s2193_s5  ;;  %p2199_p0 = scmp.lt.s32.totalorder %s2193_s5, %s2193_s5 }
 0x13c   :  { %2010 = vmatpush3.bf16.msra.mxu1 %v2009_v8 }
 0x13d   :  { %2012 = vmatprep.subr.bf16.mxu1 %v2011_v17  ;;  %1994 = vmatpush3.bf16.msra.mxu0 %v1993_v27  ;;  %v2037_v17 = vpack.c.bf16 %v1340_v14, %v1339_v13  ;;  %v2046_v27 = vpack.c.bf16 %v1346_v26, %v1345_v25  ;;  %p2200_p1 = por %p2199_p0, %p2198_p13 }
 0x13e   :  { %2027 = vmatprep.subr.bf16.mxu0 %v2234_v48 }
 0x13f   :  { %p2201_p2 = pnand %p2200_p1, %p2194_p12 }
 0x140   :  { %2014 = vmatpush3.bf16.msra.mxu1 %v2013_v40  ;;  %v2040_v40 = vpack.c.bf16 %v1342_v20, %v1341_v19 }
 0x141   :  { %2016 = vmatprep.subr.bf16.mxu1 %v2015_v30  ;;  %v2049_v30 = vpack.c.bf16 %v1348_v29, %v1347_v28 }
 0x144   :  { %2018 = vmatpush3.bf16.msra.mxu1 %v2017_v35 }
 0x145   :  { %2020 = vmatprep.subr.bf16.mxu1 %v2019_v38 }
 0x148   :  { %2022 = vmatpush3.bf16.msra.mxu1 %v2021_v41 }
 0x149   :  { %2024 = vmatprep.subr.bf16.mxu1 %v2023_v44 }
 0x14c   :  { %2026 = vmatpush3.bf16.msra.mxu1 %v2025_v47 }
 0x1f3   :  { %v757_v54 = vpop.f32.mrb[0].mxu0 }
 0x1f4   :  { %v2051_v55 = vadd.f32 %v757_v54, %v488_v52  ;;  %v759_v56 = vpop.f32.mrb[1].mxu0 }
 0x1f5   :  { %v2053_v18 = vadd.f32 %v759_v56, %v492_v53 }
 0x1f6   :  { %v2052_v21 = vadd.f32 %v2051_v55, %v2388_v3  ;;  %v496_v3 = vrot.slane %v483_v50, %v495_v61 }
 0x1f7   :  { %v2054_v59 = vadd.f32 %v2053_v18, %v2390_v5  ;;  %v2031_v5 = vpack.c.bf16 %v1336_v33, %v1335_v2 }
 0x1f8   :  { %v1117_v63 = vmul.f32 %v2052_v21, %v2052_v21 }
 0x1f9   :  { %v1118_v60 = vmul.f32 %v2054_v59, %v2054_v59 }
 0x1fb   :  { %1256 = vmatprep.mubr.f32.mxu0 %v1118_v60 }
 0x1fc   :  { %1257 = vmatmul.mubr.f32.vlgmr.msra.gmra.mrb[2].mxu0 %v1117_v63 }
 0x1fd   :  { %2029 = vmatpush3.bf16.msra.mxu0 %v2028_v62  ;;  %1568 = vmatprep.mubr.msk.f32.mxu0 %vm2235_vm1, %v2232_v0 }
 0x1fe   :  { %2030 = vmatprep.subr.bf16.mxu0 %v2234_v48 }
 0x201   :  { %2032 = vmatpush3.bf16.msra.mxu0 %v2031_v5 }
 0x202   :  { %v1112_v8 = vpop.f32.mrb[2].mxu1  ;;  %2033 = vmatprep.subr.bf16.mxu0 %v2234_v48 }
 0x203   :  { %v2055_v9 = vadd.f32 %v1112_v8, %v496_v3  ;;  %v1114_v10 = vpop.f32.mrb[3].mxu1 }
 0x204   :  { %v2056_v12 = vadd.f32 %v1114_v10, %v500_v6 }
 0x205   :  { %v1119_v16 = vmul.f32 %v2055_v9, %v2055_v9  ;;  %2035 = vmatpush3.bf16.msra.mxu0 %v2034_v11 }
 0x206   :  { %v1120_v15 = vmul.f32 %v2056_v12, %v2056_v12  ;;  %2036 = vmatprep.subr.bf16.mxu0 %v2234_v48 }
 0x208   :  { %1326 = vmatprep.mubr.f32.mxu1 %v1120_v15 }
 0x209   :  { %1327 = vmatmul.mubr.f32.vlgmr.msra.gmra.mrb[4].mxu1 %v1119_v16  ;;  %2038 = vmatpush3.bf16.msra.mxu0 %v2037_v17 }
 0x20a   :  { %2039 = vmatprep.subr.bf16.mxu0 %v2234_v48 }
 0x20d   :  { %2041 = vmatpush3.bf16.msra.mxu0 %v2040_v40 }
 0x20e   :  { %2042 = vmatprep.subr.bf16.mxu0 %v2234_v48 }
 0x211   :  { %2044 = vmatpush3.bf16.msra.mxu0 %v2043_v24 }
 0x212   :  { %2045 = vmatprep.subr.bf16.mxu0 %v2234_v48 }
 0x215   :  { %2047 = vmatpush3.bf16.msra.mxu0 %v2046_v27 }
 0x216   :  { %2048 = vmatprep.subr.bf16.mxu0 %v2234_v48 }
 0x219   :  { %2050 = vmatpush3.bf16.msra.mxu0 %v2049_v30 }
 0x2cf   :  { %v1481_v32 = vpop.f32.mrb[2].mxu0 }
 0x2d0   :  { %v1482_v34 = vpop.f32.mrb[3].mxu0 }
 0x2d1   :  { %v1483_v35 = vadd.f32 %v1482_v34, %v1481_v32 }
 0x2d3   :  { %v1259_v31 = vadd.f32 %v1483_v35, %v1447_v36 }
 0x2dc   :  { %v1516_v37 = vpop.f32.mrb[4].mxu1 }
 0x2dd   :  { %v1517_v38 = vpop.f32.mrb[5].mxu1 }
 0x2de   :  { %v1518_v39 = vadd.f32 %v1517_v38, %v1516_v37 }
 0x2e0   :  { %v1329_v41 = vadd.f32 %v1518_v39, %v1259_v31 }
 0x2e2   :  { %v1332_v42 = vmul.f32 %v1329_v41, %v1329_v41 }
 0x2e4   :  { %1569 = vmatmul.mubr.f32.vlgmr.msra.gmra.mrb[4].mxu0 %v1332_v42 }
 0x3b7   :  { %v1422_v44 = vpop.f32.mrb[4].mxu0 }
 0x3b8   :  { %v1423_v46 = vadd.f32 %v1448_v43, %v1422_v44  ;;  %v1570_v45 = vpop.f32.mrb[5].mxu0 }
 0x3ba   :  { %1427 = vst.msk [vmem:[#allocation11] sm:$0x3] %vm1426_vm2, %v1423_v46 }
 0x3bb   :  { %2204 = shalt.err (!%p2201_p2)
}
 0x3bc   :  { %s2205_s2 = scalar_lea.hbm %s2466_s7, 32 }
 0x3bd   :  { %p2206_p3 = scmp.ne.s32.totalorder %s2466_s7, %s2205_s2  ;;  %p2209_p4 = scmp.lt.u32.totalorder %s2205_s2, %s2466_s7 }
 0x3bf   :  { %p2211_p5 = pnand %p2209_p4, %p2206_p3 }
 0x3c1   :  { %2214 = shalt.err (!%p2211_p5)
}
 0x3c2   :  { %1437 = dma.vmem_to_hbm [thread:$0]  %s1435_s21, 32, %s2466_s7, [#allocation4]  }
 0x3c3   :  { %2221 = dma.done.wait [#allocation4], 32  }
 0x3c4   :  { %2222 = vsyncadd [#allocation4], 4294967264 }
 0x3c5   :  { %1441 = vsyncpa [#allocation3], 1 }
 0x3c6   :  { %1442 = vsyncpa [#allocation6], 1 }
 0x3c7   :  { %1443 = vsyncpa [#allocation9], 1 }
 0x3c8   :  { %1444 = vsyncpa [#allocation4], 1 }

</bundles_post_ra>
